<compile_context>
chip_gen: v5e
topology: v5e:2x2
jax: 0.10.0
libtpu: 0.0.40
codegen_flags: <defaults>
</compile_context>

<pallas_src>
import functools

import jax
import jax.numpy as jnp
from jax import lax
from jax.experimental import pallas as pl
from jax.experimental.pallas import tpu as pltpu

EPS_MVN = 1e-5   # eps in calc_mean_std
EPS_PD = 1e-6    # eps in F.pairwise_distance (added to the difference)
LANE = 128       # TPU lane width; the feature dim is padded up to a multiple of this


def _cross_feat_kernel(src_ref, tgt_ref,
                       wf_ref, bf_ref,
                       wg_ref, bg_ref,
                       wh_ref, bh_ref,
                       wp_ref, bp_ref,
                       gate_ref,
                       out_ref,
                       feat_scr,
                       *, d_real):
    bb, p, dp = src_ref.shape        # static block shape: (batch tile, tokens, padded feat)
    m = bb * p
    # PyTorch .var(dim=1) is unbiased (divide by P-1).  P == 1 would divide by zero in
    # the original module as well; the max() only avoids a compile-time 1/0.
    inv_pm1 = 1.0 / max(p - 1, 1)

    s3 = src_ref[...]                # (bb, p, dp) f32
    t3 = tgt_ref[...]

    # ---- mean-variance norm, per batch element over the token axis (f32; rsqrt -> EUP) ----
    def mvn(x):
        mean = jnp.mean(x, axis=1, keepdims=True)
        c = x - mean
        var = jnp.sum(c * c, axis=1, keepdims=True) * inv_pm1
        return c * lax.rsqrt(var + EPS_MVN)

    s_norm = mvn(s3).reshape(m, dp)
    t_norm = mvn(t3).reshape(m, dp)
    s_raw = s3.reshape(m, dp)
    t_raw = t3.reshape(m, dp)

    # ---- token-wise Linears batched over all bb*p rows; bf16 operands, f32 accumulation ----
    def lin(x, w_ref, b_ref):
        return jnp.dot(x.astype(jnp.bfloat16), w_ref[...],
                       preferred_element_type=jnp.float32) + b_ref[...]

    src_f = lin(s_norm, wf_ref, bf_ref).astype(jnp.bfloat16)   # f(mvn(source))
    trg_g = lin(t_norm, wg_ref, bg_ref).astype(jnp.bfloat16)   # g(mvn(target))
    src_v = lin(s_raw, wh_ref, bh_ref).astype(jnp.bfloat16)    # h(source)

    gate = gate_ref[...]             # (1, dp) = sigmoid(gating_param), precomputed on host
    inv_gate = 1.0 - gate

    if d_real != dp:
        row_ok = lax.broadcasted_iota(jnp.int32, (dp, dp), 0) < d_real
    else:
        row_ok = None

    def softmax_cols(x):
        # Softmax over axis 0 of a (dp, dp) tile; padded feature rows are masked out of
        # the normalisation.  Reciprocal goes to the EUP (free slot).
        if row_ok is not None:
            x = jnp.where(row_ok, x, jnp.float32(-1e30))
        mx = jnp.max(x, axis=0, keepdims=True)
        e = jnp.exp(x - mx)
        return e * pl.reciprocal(jnp.sum(e, axis=0, keepdims=True), approx=True)

    # ---- per-batch DxD attention: the only part that cannot be folded into M ----
    for b in range(bb):
        lo, hi = b * p, (b + 1) * p
        sf = src_f[lo:hi]            # (p, dp) bf16
        tg = trg_g[lo:hi]
        sv = src_v[lo:hi]

        # logits[i, j] = sum_p sf[p, i] * tg[p, j]  (= src^T @ trg).  The t2s logits are
        # exactly logits^T, so only one MXU matmul is issued; the transpose is XLU work.
        logits = lax.dot_general(sf, tg, (((0,), (0,)), ((), ())),
                                 preferred_element_type=jnp.float32)   # (dp, dp) f32

        # Build attn already transposed:
        #   attn^T[j, i] = (1 - g[i]) * s2t[i, j] + g[i] * t2s[i, j]
        # and, read at [j, i]:  s2t == column-softmax(logits^T), t2s == column-softmax(logits).
        attn_t = inv_gate * softmax_cols(logits.T) + gate * softmax_cols(logits)

        # feat[p, i] = sum_j sv[p, j] * attn^T[j, i]  — plain (1,0) contraction, no relayout.
        feat_scr[lo:hi, :] = jnp.dot(sv, attn_t.astype(jnp.bfloat16),
                                     preferred_element_type=jnp.float32)

    # ---- prj, again batched over all bb*p rows ----
    feat = lin(feat_scr[...], wp_ref, bp_ref)                  # (m, dp) f32

    # ---- pairwise distance per token over the (real) feature dim ----
    diff = s_raw - t_raw + EPS_PD
    if d_real != dp:
        lane_ok = lax.broadcasted_iota(jnp.int32, (1, dp), 1) < d_real
        diff = jnp.where(lane_ok, diff, 0.0)
    pdist = jnp.sqrt(jnp.sum(diff * diff, axis=-1, keepdims=True))   # (m, 1)

    out_ref[...] = (feat * pdist).reshape(bb, p, dp)


def cross_feat_trans(source, target, params, *, block_b=None):
    """source, target: (B, P, D) float32.  Returns (B, P, D) float32."""
    B, P, D = source.shape
    Dp = ((D + LANE - 1) // LANE) * LANE         # lane-dense padded feature dim
    pad_d = Dp - D

    if block_b is None:
        # Largest divisor of B that is <= 8: folds several batch elements into the M
        # dimension of the linears.  (On v7x with a tiny B you may prefer a smaller
        # block_b so the "parallel" grid has >= 2 steps for the two TensorCores.)
        block_b = 1
        for cand in range(min(B, 8), 0, -1):
            if B % cand == 0:
                block_b = cand
                break
    assert B % block_b == 0, "block_b must divide the batch size"
    grid = (B // block_b,)

    def pad_tokens(x):
        return jnp.pad(x, ((0, 0), (0, 0), (0, pad_d))) if pad_d else x

    def pad_w(w):    # (D, D) torch Linear weight -> pre-transposed, padded, bf16
        wt = w.T
        if pad_d:
            wt = jnp.pad(wt, ((0, pad_d), (0, pad_d)))
        return wt.astype(jnp.bfloat16)

    def pad_vec(v):
        if pad_d:
            v = jnp.pad(v, (0, pad_d))
        return v.reshape(1, Dp).astype(jnp.float32)

    src_p = pad_tokens(source)
    tgt_p = pad_tokens(target)
    wf_t, wg_t, wh_t, wp_t = (pad_w(params[k]) for k in ("wf", "wg", "wh", "wp"))
    bf, bg, bh, bp = (pad_vec(params[k]) for k in ("bf", "bg", "bh", "bp"))
    gate = pad_vec(jax.nn.sigmoid(params["gate"]))   # host-side sigmoid, lane-dense row

    batch_spec = pl.BlockSpec((block_b, P, Dp), lambda b: (b, 0, 0))
    # Weights stay fully VMEM-resident (tiny here).  For very large in_planes on v7x
    # (64 MiB VMEM) tile the weights along their N dim with a second grid axis instead.
    w_spec = pl.BlockSpec((Dp, Dp), lambda b: (0, 0))
    v_spec = pl.BlockSpec((1, Dp), lambda b: (0, 0))

    cost = pl.CostEstimate(
        flops=12 * B * P * Dp * Dp,                 # 4 linears + logits + feat matmuls
        transcendentals=2 * B * Dp * Dp,            # two softmax exps per batch element
        bytes_accessed=3 * B * P * Dp * 4 + 4 * Dp * Dp * 2 + 5 * Dp * 4,
    )

    out_padded = pl.pallas_call(
        functools.partial(_cross_feat_kernel, d_real=D),
        out_shape=jax.ShapeDtypeStruct((B, P, Dp), jnp.float32),
        grid_spec=pltpu.PrefetchScalarGridSpec(
            num_scalar_prefetch=0,
            grid=grid,
            in_specs=[batch_spec, batch_spec,
                      w_spec, v_spec,
                      w_spec, v_spec,
                      w_spec, v_spec,
                      w_spec, v_spec,
                      v_spec],
            out_specs=batch_spec,
            scratch_shapes=[pltpu.VMEM((block_b * P, Dp), jnp.float32)],
        ),
        compiler_params=pltpu.CompilerParams(dimension_semantics=("parallel",)),
        cost_estimate=cost,
    )(src_p, tgt_p, wf_t, bf, wg_t, bg, wh_t, bh, wp_t, bp, gate)

    return out_padded[:, :, :D] if pad_d else out_padded


# ----------------------------- references (verification) -----------------------------

def reference_forward(source, target, params):
    """Pure-f32 JAX mirror of the PyTorch forward (exact semantics)."""
    def mvn(x):
        mean = jnp.mean(x, axis=1, keepdims=True)
        var = jnp.var(x, axis=1, keepdims=True, ddof=1) + EPS_MVN
        return (x - mean) / jnp.sqrt(var)

    def lin(x, w, b):
        return x @ w.T + b

    src = lin(mvn(source), params["wf"], params["bf"])
    trg = lin(mvn(target), params["wg"], params["bg"])
    s2t = jax.nn.softmax(jnp.einsum("bpi,bpj->bij", src, trg), axis=-1)
    t2s = jax.nn.softmax(jnp.einsum("bpi,bpj->bij", trg, src), axis=-1)
    g = jax.nn.sigmoid(params["gate"])[None, :, None]     # gates rows of attn
    attn = (1.0 - g) * s2t + g * t2s
    src_v = lin(source, params["wh"], params["bh"])
    feat = jnp.einsum("bpj,bij->bpi", src_v, attn)
    feat = lin(feat, params["wp"], params["bp"])
    pdist = jnp.sqrt(jnp.sum((source - target + EPS_PD) ** 2, axis=-1, keepdims=True))
    return feat * pdist


def reference_forward_bf16(source, target, params):
    """Same math, but with bf16 matmul operands / f32 accumulation (mirrors the kernel's
    precision choices) for a tight structural check."""
    bf16 = jnp.bfloat16

    def mvn(x):
        mean = jnp.mean(x, axis=1, keepdims=True)
        c = x - mean
        var = jnp.sum(c * c, axis=1, keepdims=True) / (x.shape[1] - 1)
        return c * lax.rsqrt(var + EPS_MVN)

    def lin(x, w, b):
        return jnp.dot(x.astype(bf16), w.T.astype(bf16),
                       preferred_element_type=jnp.float32) + b

    src = lin(mvn(source), params["wf"], params["bf"]).astype(bf16)
    trg = lin(mvn(target), params["wg"], params["bg"]).astype(bf16)
    logits = jnp.einsum("bpi,bpj->bij", src, trg, preferred_element_type=jnp.float32)
    s2t = jax.nn.softmax(logits, axis=-1)
    t2s = jax.nn.softmax(jnp.swapaxes(logits, -1, -2), axis=-1)
    g = jax.nn.sigmoid(params["gate"])[None, :, None]
    attn = (1.0 - g) * s2t + g * t2s
    src_v = lin(source, params["wh"], params["bh"]).astype(bf16)
    feat = jnp.einsum("bpj,bij->bpi", src_v, attn.astype(bf16),
                      preferred_element_type=jnp.float32)
    feat = lin(feat, params["wp"], params["bp"])
    pdist = jnp.sqrt(jnp.sum((source - target + EPS_PD) ** 2, axis=-1, keepdims=True))
    return feat * pdist


def init_params(key, d):
    ks = jax.random.split(key, 8)
    bound = 1.0 / jnp.sqrt(d)
    u = lambda k, shape: jax.random.uniform(k, shape, jnp.float32, -bound, bound)
    return {
        "wf": u(ks[0], (d, d)), "bf": u(ks[1], (d,)),
        "wg": u(ks[2], (d, d)), "bg": u(ks[3], (d,)),
        "wh": u(ks[4], (d, d)), "bh": u(ks[5], (d,)),
        "wp": u(ks[6], (d, d)), "bp": u(ks[7], (d,)),
        "gate": jnp.ones((d,), jnp.float32),   # nn.Parameter(torch.ones(in_planes))
    }


if __name__ == "__main__":
    B, P, D = 2, 8, 32   # batch, tokens, in_planes

    key = jax.random.PRNGKey(0)
    k_src, k_tgt, k_par = jax.random.split(key, 3)
    source = jax.random.normal(k_src, (B, P, D), jnp.float32)
    target = jax.random.normal(k_tgt, (B, P, D), jnp.float32)
    params = init_params(k_par, D)

    out = cross_feat_trans(source, target, params)
    out = jax.block_until_ready(out)
    assert out.shape == (B, P, D)

    # Tight check vs. a reference that mirrors the kernel's bf16-matmul precision.
    ref_bf16 = reference_forward_bf16(source, target, params)
    assert jnp.allclose(out, ref_bf16, rtol=1e-2, atol=1e-2), (
        "mismatch vs bf16-precision reference, max abs err "
        f"{jnp.max(jnp.abs(out - ref_bf16))}")

    # Loose sanity check vs. the exact f32 reference (bf16 matmul operands introduce
    # ~1%-level differences by design).
    ref_f32 = reference_forward(source, target, params)
    assert jnp.allclose(out, ref_f32, rtol=1e-1, atol=1e-1), (
        "mismatch vs f32 reference, max abs err "
        f"{jnp.max(jnp.abs(out - ref_f32))}")

    print("KERNEL_OK")
</pallas_src>

<mosaic_0001>
module attributes {stable_mosaic.version = 11 : i64} {
  func.func @_cross_feat_kernel(%arg0: i32, %arg1: memref<2x8x128xf32, #tpu.memory_space<vmem>>, %arg2: memref<2x8x128xf32, #tpu.memory_space<vmem>>, %arg3: memref<128x128xbf16, #tpu.memory_space<vmem>>, %arg4: memref<1x128xf32, #tpu.memory_space<vmem>>, %arg5: memref<128x128xbf16, #tpu.memory_space<vmem>>, %arg6: memref<1x128xf32, #tpu.memory_space<vmem>>, %arg7: memref<128x128xbf16, #tpu.memory_space<vmem>>, %arg8: memref<1x128xf32, #tpu.memory_space<vmem>>, %arg9: memref<128x128xbf16, #tpu.memory_space<vmem>>, %arg10: memref<1x128xf32, #tpu.memory_space<vmem>>, %arg11: memref<1x128xf32, #tpu.memory_space<vmem>>, %arg12: memref<2x8x128xf32, #tpu.memory_space<vmem>>, %arg13: memref<16x128xf32, #tpu.memory_space<vmem>>) attributes {dimension_semantics = [#tpu.dimension_semantics<parallel>], iteration_bounds = array<i64: 1>, scalar_prefetch = 0 : i64, scratch_operands = 1 : i64, tpu.core_type = #tpu.core_type<tc>, window_params = [{transform_indices = @transform_0, window_bounds = array<i64: 2, 8, 128>}, {transform_indices = @transform_1, window_bounds = array<i64: 2, 8, 128>}, {pipeline_mode = #tpu.pipeline_mode<synchronous>, transform_indices = @transform_2, window_bounds = array<i64: 128, 128>}, {pipeline_mode = #tpu.pipeline_mode<synchronous>, transform_indices = @transform_3, window_bounds = array<i64: 1, 128>}, {pipeline_mode = #tpu.pipeline_mode<synchronous>, transform_indices = @transform_4, window_bounds = array<i64: 128, 128>}, {pipeline_mode = #tpu.pipeline_mode<synchronous>, transform_indices = @transform_5, window_bounds = array<i64: 1, 128>}, {pipeline_mode = #tpu.pipeline_mode<synchronous>, transform_indices = @transform_6, window_bounds = array<i64: 128, 128>}, {pipeline_mode = #tpu.pipeline_mode<synchronous>, transform_indices = @transform_7, window_bounds = array<i64: 1, 128>}, {pipeline_mode = #tpu.pipeline_mode<synchronous>, transform_indices = @transform_8, window_bounds = array<i64: 128, 128>}, {pipeline_mode = #tpu.pipeline_mode<synchronous>, transform_indices = @transform_9, window_bounds = array<i64: 1, 128>}, {pipeline_mode = #tpu.pipeline_mode<synchronous>, transform_indices = @transform_10, window_bounds = array<i64: 1, 128>}, {transform_indices = @transform_11, window_bounds = array<i64: 2, 8, 128>}]} {
    %c0 = arith.constant 0 : index
    %c0_0 = arith.constant 0 : index
    %c0_1 = arith.constant 0 : index
    %0 = vector.load %arg1[%c0, %c0_0, %c0_1] : memref<2x8x128xf32, #tpu.memory_space<vmem>>, vector<2x8x128xf32>
    %c0_2 = arith.constant 0 : index
    %c0_3 = arith.constant 0 : index
    %c0_4 = arith.constant 0 : index
    %1 = vector.load %arg2[%c0_2, %c0_3, %c0_4] : memref<2x8x128xf32, #tpu.memory_space<vmem>>, vector<2x8x128xf32>
    %cst = arith.constant dense<0.000000e+00> : vector<2x128xf32>
    %2 = vector.multi_reduction <add>, %0, %cst [1] : vector<2x8x128xf32> to vector<2x128xf32>
    %3 = vector.shape_cast %2 : vector<2x128xf32> to vector<2x1x128xf32>
    %cst_5 = arith.constant 8.000000e+00 : f32
    %4 = vector.broadcast %cst_5 : f32 to vector<2x1x128xf32>
    %5 = arith.divf %3, %4 : vector<2x1x128xf32>
    %6 = vector.broadcast %5 : vector<2x1x128xf32> to vector<2x8x128xf32>
    %7 = arith.subf %0, %6 : vector<2x8x128xf32>
    %8 = arith.mulf %7, %7 : vector<2x8x128xf32>
    %cst_6 = arith.constant dense<0.000000e+00> : vector<2x128xf32>
    %9 = vector.multi_reduction <add>, %8, %cst_6 [1] : vector<2x8x128xf32> to vector<2x128xf32>
    %10 = vector.shape_cast %9 : vector<2x128xf32> to vector<2x1x128xf32>
    %cst_7 = arith.constant 0.142857149 : f32
    %11 = vector.broadcast %cst_7 : f32 to vector<2x1x128xf32>
    %12 = arith.mulf %10, %11 : vector<2x1x128xf32>
    %cst_8 = arith.constant 9.99999974E-6 : f32
    %13 = vector.broadcast %cst_8 : f32 to vector<2x1x128xf32>
    %14 = arith.addf %12, %13 : vector<2x1x128xf32>
    %15 = math.rsqrt %14 : vector<2x1x128xf32>
    %16 = vector.broadcast %15 : vector<2x1x128xf32> to vector<2x8x128xf32>
    %17 = arith.mulf %7, %16 : vector<2x8x128xf32>
    %18 = vector.shape_cast %17 : vector<2x8x128xf32> to vector<16x128xf32>
    %cst_9 = arith.constant dense<0.000000e+00> : vector<2x128xf32>
    %19 = vector.multi_reduction <add>, %1, %cst_9 [1] : vector<2x8x128xf32> to vector<2x128xf32>
    %20 = vector.shape_cast %19 : vector<2x128xf32> to vector<2x1x128xf32>
    %cst_10 = arith.constant 8.000000e+00 : f32
    %21 = vector.broadcast %cst_10 : f32 to vector<2x1x128xf32>
    %22 = arith.divf %20, %21 : vector<2x1x128xf32>
    %23 = vector.broadcast %22 : vector<2x1x128xf32> to vector<2x8x128xf32>
    %24 = arith.subf %1, %23 : vector<2x8x128xf32>
    %25 = arith.mulf %24, %24 : vector<2x8x128xf32>
    %cst_11 = arith.constant dense<0.000000e+00> : vector<2x128xf32>
    %26 = vector.multi_reduction <add>, %25, %cst_11 [1] : vector<2x8x128xf32> to vector<2x128xf32>
    %27 = vector.shape_cast %26 : vector<2x128xf32> to vector<2x1x128xf32>
    %cst_12 = arith.constant 0.142857149 : f32
    %28 = vector.broadcast %cst_12 : f32 to vector<2x1x128xf32>
    %29 = arith.mulf %27, %28 : vector<2x1x128xf32>
    %cst_13 = arith.constant 9.99999974E-6 : f32
    %30 = vector.broadcast %cst_13 : f32 to vector<2x1x128xf32>
    %31 = arith.addf %29, %30 : vector<2x1x128xf32>
    %32 = math.rsqrt %31 : vector<2x1x128xf32>
    %33 = vector.broadcast %32 : vector<2x1x128xf32> to vector<2x8x128xf32>
    %34 = arith.mulf %24, %33 : vector<2x8x128xf32>
    %35 = vector.shape_cast %34 : vector<2x8x128xf32> to vector<16x128xf32>
    %36 = vector.shape_cast %0 : vector<2x8x128xf32> to vector<16x128xf32>
    %37 = vector.shape_cast %1 : vector<2x8x128xf32> to vector<16x128xf32>
    %38 = arith.truncf %18 : vector<16x128xf32> to vector<16x128xbf16>
    %c0_14 = arith.constant 0 : index
    %c0_15 = arith.constant 0 : index
    %39 = vector.load %arg3[%c0_14, %c0_15] : memref<128x128xbf16, #tpu.memory_space<vmem>>, vector<128x128xbf16>
    %cst_16 = arith.constant dense<0.000000e+00> : vector<16x128xf32>
    %40 = tpu.matmul %38, %39, %cst_16 {dimension_numbers = #tpu.dot_dimension_numbers<[1], [0], [0], [1], [0, 0, 1, 1], [], []>} : vector<16x128xbf16>, vector<128x128xbf16>, vector<16x128xf32> -> vector<16x128xf32>
    %c0_17 = arith.constant 0 : index
    %c0_18 = arith.constant 0 : index
    %41 = vector.load %arg4[%c0_17, %c0_18] : memref<1x128xf32, #tpu.memory_space<vmem>>, vector<1x128xf32>
    %42 = vector.broadcast %41 : vector<1x128xf32> to vector<16x128xf32>
    %43 = arith.addf %40, %42 : vector<16x128xf32>
    %44 = arith.truncf %43 : vector<16x128xf32> to vector<16x128xbf16>
    %45 = arith.truncf %35 : vector<16x128xf32> to vector<16x128xbf16>
    %c0_19 = arith.constant 0 : index
    %c0_20 = arith.constant 0 : index
    %46 = vector.load %arg5[%c0_19, %c0_20] : memref<128x128xbf16, #tpu.memory_space<vmem>>, vector<128x128xbf16>
    %cst_21 = arith.constant dense<0.000000e+00> : vector<16x128xf32>
    %47 = tpu.matmul %45, %46, %cst_21 {dimension_numbers = #tpu.dot_dimension_numbers<[1], [0], [0], [1], [0, 0, 1, 1], [], []>} : vector<16x128xbf16>, vector<128x128xbf16>, vector<16x128xf32> -> vector<16x128xf32>
    %c0_22 = arith.constant 0 : index
    %c0_23 = arith.constant 0 : index
    %48 = vector.load %arg6[%c0_22, %c0_23] : memref<1x128xf32, #tpu.memory_space<vmem>>, vector<1x128xf32>
    %49 = vector.broadcast %48 : vector<1x128xf32> to vector<16x128xf32>
    %50 = arith.addf %47, %49 : vector<16x128xf32>
    %51 = arith.truncf %50 : vector<16x128xf32> to vector<16x128xbf16>
    %52 = arith.truncf %36 : vector<16x128xf32> to vector<16x128xbf16>
    %c0_24 = arith.constant 0 : index
    %c0_25 = arith.constant 0 : index
    %53 = vector.load %arg7[%c0_24, %c0_25] : memref<128x128xbf16, #tpu.memory_space<vmem>>, vector<128x128xbf16>
    %cst_26 = arith.constant dense<0.000000e+00> : vector<16x128xf32>
    %54 = tpu.matmul %52, %53, %cst_26 {dimension_numbers = #tpu.dot_dimension_numbers<[1], [0], [0], [1], [0, 0, 1, 1], [], []>} : vector<16x128xbf16>, vector<128x128xbf16>, vector<16x128xf32> -> vector<16x128xf32>
    %c0_27 = arith.constant 0 : index
    %c0_28 = arith.constant 0 : index
    %55 = vector.load %arg8[%c0_27, %c0_28] : memref<1x128xf32, #tpu.memory_space<vmem>>, vector<1x128xf32>
    %56 = vector.broadcast %55 : vector<1x128xf32> to vector<16x128xf32>
    %57 = arith.addf %54, %56 : vector<16x128xf32>
    %58 = arith.truncf %57 : vector<16x128xf32> to vector<16x128xbf16>
    %c0_29 = arith.constant 0 : index
    %c0_30 = arith.constant 0 : index
    %59 = vector.load %arg11[%c0_29, %c0_30] : memref<1x128xf32, #tpu.memory_space<vmem>>, vector<1x128xf32>
    %cst_31 = arith.constant 1.000000e+00 : f32
    %60 = vector.broadcast %cst_31 : f32 to vector<1x128xf32>
    %61 = arith.subf %60, %59 : vector<1x128xf32>
    %62 = tpu.iota {dimensions = array<i32: 0>} : vector<128x128xi32>
    %c32_i32 = arith.constant 32 : i32
    %63 = vector.broadcast %c32_i32 : i32 to vector<128x128xi32>
    %64 = arith.cmpi slt, %62, %63 : vector<128x128xi32>
    %65 = vector.extract_strided_slice %44 {offsets = [0, 0], sizes = [8, 128], strides = [1, 1]} : vector<16x128xbf16> to vector<8x128xbf16>
    %66 = vector.extract_strided_slice %51 {offsets = [0, 0], sizes = [8, 128], strides = [1, 1]} : vector<16x128xbf16> to vector<8x128xbf16>
    %67 = vector.extract_strided_slice %58 {offsets = [0, 0], sizes = [8, 128], strides = [1, 1]} : vector<16x128xbf16> to vector<8x128xbf16>
    %cst_32 = arith.constant dense<0.000000e+00> : vector<128x128xf32>
    %68 = tpu.matmul %65, %66, %cst_32 {dimension_numbers = #tpu.dot_dimension_numbers<[0], [0], [1], [1], [0, 1, 1, 1], [], []>} : vector<8x128xbf16>, vector<8x128xbf16>, vector<128x128xf32> -> vector<128x128xf32>
    %69 = tpu.transpose %68, [1, 0] : vector<128x128xf32> -> vector<128x128xf32>
    %cst_33 = arith.constant -1.000000e+30 : f32
    %70 = vector.broadcast %cst_33 : f32 to vector<128x128xf32>
    %71 = arith.select %64, %69, %70 : vector<128x128xi1>, vector<128x128xf32>
    %cst_34 = arith.constant dense<0xFF800000> : vector<128xf32>
    %72 = vector.multi_reduction <maximumf>, %71, %cst_34 [0] : vector<128x128xf32> to vector<128xf32>
    %73 = vector.shape_cast %72 : vector<128xf32> to vector<1x128xf32>
    %74 = vector.broadcast %73 : vector<1x128xf32> to vector<128x128xf32>
    %75 = arith.subf %71, %74 : vector<128x128xf32>
    %76 = math.exp %75 : vector<128x128xf32>
    %cst_35 = arith.constant dense<0.000000e+00> : vector<128xf32>
    %77 = vector.multi_reduction <add>, %76, %cst_35 [0] : vector<128x128xf32> to vector<128xf32>
    %78 = vector.shape_cast %77 : vector<128xf32> to vector<1x128xf32>
    %79 = tpu.reciprocal %78 {approx = true} : vector<1x128xf32> -> vector<1x128xf32>
    %80 = vector.broadcast %79 : vector<1x128xf32> to vector<128x128xf32>
    %81 = arith.mulf %76, %80 : vector<128x128xf32>
    %82 = vector.broadcast %61 : vector<1x128xf32> to vector<128x128xf32>
    %83 = arith.mulf %82, %81 : vector<128x128xf32>
    %cst_36 = arith.constant -1.000000e+30 : f32
    %84 = vector.broadcast %cst_36 : f32 to vector<128x128xf32>
    %85 = arith.select %64, %68, %84 : vector<128x128xi1>, vector<128x128xf32>
    %cst_37 = arith.constant dense<0xFF800000> : vector<128xf32>
    %86 = vector.multi_reduction <maximumf>, %85, %cst_37 [0] : vector<128x128xf32> to vector<128xf32>
    %87 = vector.shape_cast %86 : vector<128xf32> to vector<1x128xf32>
    %88 = vector.broadcast %87 : vector<1x128xf32> to vector<128x128xf32>
    %89 = arith.subf %85, %88 : vector<128x128xf32>
    %90 = math.exp %89 : vector<128x128xf32>
    %cst_38 = arith.constant dense<0.000000e+00> : vector<128xf32>
    %91 = vector.multi_reduction <add>, %90, %cst_38 [0] : vector<128x128xf32> to vector<128xf32>
    %92 = vector.shape_cast %91 : vector<128xf32> to vector<1x128xf32>
    %93 = tpu.reciprocal %92 {approx = true} : vector<1x128xf32> -> vector<1x128xf32>
    %94 = vector.broadcast %93 : vector<1x128xf32> to vector<128x128xf32>
    %95 = arith.mulf %90, %94 : vector<128x128xf32>
    %96 = vector.broadcast %59 : vector<1x128xf32> to vector<128x128xf32>
    %97 = arith.mulf %96, %95 : vector<128x128xf32>
    %98 = arith.addf %83, %97 : vector<128x128xf32>
    %99 = arith.truncf %98 : vector<128x128xf32> to vector<128x128xbf16>
    %cst_39 = arith.constant dense<0.000000e+00> : vector<8x128xf32>
    %100 = tpu.matmul %67, %99, %cst_39 {dimension_numbers = #tpu.dot_dimension_numbers<[1], [0], [0], [1], [0, 0, 1, 1], [], []>} : vector<8x128xbf16>, vector<128x128xbf16>, vector<8x128xf32> -> vector<8x128xf32>
    %c0_40 = arith.constant 0 : index
    %c0_41 = arith.constant 0 : index
    %101 = vector.load %arg13[%c0_40, %c0_41] : memref<16x128xf32, #tpu.memory_space<vmem>>, vector<8x128xf32>
    tpu.vector_store %arg13[%c0_40, %c0_41], %100 {strides = array<i32>} : memref<16x128xf32, #tpu.memory_space<vmem>>, vector<8x128xf32>,
    %102 = vector.extract_strided_slice %44 {offsets = [8, 0], sizes = [8, 128], strides = [1, 1]} : vector<16x128xbf16> to vector<8x128xbf16>
    %103 = vector.extract_strided_slice %51 {offsets = [8, 0], sizes = [8, 128], strides = [1, 1]} : vector<16x128xbf16> to vector<8x128xbf16>
    %104 = vector.extract_strided_slice %58 {offsets = [8, 0], sizes = [8, 128], strides = [1, 1]} : vector<16x128xbf16> to vector<8x128xbf16>
    %cst_42 = arith.constant dense<0.000000e+00> : vector<128x128xf32>
    %105 = tpu.matmul %102, %103, %cst_42 {dimension_numbers = #tpu.dot_dimension_numbers<[0], [0], [1], [1], [0, 1, 1, 1], [], []>} : vector<8x128xbf16>, vector<8x128xbf16>, vector<128x128xf32> -> vector<128x128xf32>
    %106 = tpu.transpose %105, [1, 0] : vector<128x128xf32> -> vector<128x128xf32>
    %cst_43 = arith.constant -1.000000e+30 : f32
    %107 = vector.broadcast %cst_43 : f32 to vector<128x128xf32>
    %108 = arith.select %64, %106, %107 : vector<128x128xi1>, vector<128x128xf32>
    %cst_44 = arith.constant dense<0xFF800000> : vector<128xf32>
    %109 = vector.multi_reduction <maximumf>, %108, %cst_44 [0] : vector<128x128xf32> to vector<128xf32>
    %110 = vector.shape_cast %109 : vector<128xf32> to vector<1x128xf32>
    %111 = vector.broadcast %110 : vector<1x128xf32> to vector<128x128xf32>
    %112 = arith.subf %108, %111 : vector<128x128xf32>
    %113 = math.exp %112 : vector<128x128xf32>
    %cst_45 = arith.constant dense<0.000000e+00> : vector<128xf32>
    %114 = vector.multi_reduction <add>, %113, %cst_45 [0] : vector<128x128xf32> to vector<128xf32>
    %115 = vector.shape_cast %114 : vector<128xf32> to vector<1x128xf32>
    %116 = tpu.reciprocal %115 {approx = true} : vector<1x128xf32> -> vector<1x128xf32>
    %117 = vector.broadcast %116 : vector<1x128xf32> to vector<128x128xf32>
    %118 = arith.mulf %113, %117 : vector<128x128xf32>
    %119 = vector.broadcast %61 : vector<1x128xf32> to vector<128x128xf32>
    %120 = arith.mulf %119, %118 : vector<128x128xf32>
    %cst_46 = arith.constant -1.000000e+30 : f32
    %121 = vector.broadcast %cst_46 : f32 to vector<128x128xf32>
    %122 = arith.select %64, %105, %121 : vector<128x128xi1>, vector<128x128xf32>
    %cst_47 = arith.constant dense<0xFF800000> : vector<128xf32>
    %123 = vector.multi_reduction <maximumf>, %122, %cst_47 [0] : vector<128x128xf32> to vector<128xf32>
    %124 = vector.shape_cast %123 : vector<128xf32> to vector<1x128xf32>
    %125 = vector.broadcast %124 : vector<1x128xf32> to vector<128x128xf32>
    %126 = arith.subf %122, %125 : vector<128x128xf32>
    %127 = math.exp %126 : vector<128x128xf32>
    %cst_48 = arith.constant dense<0.000000e+00> : vector<128xf32>
    %128 = vector.multi_reduction <add>, %127, %cst_48 [0] : vector<128x128xf32> to vector<128xf32>
    %129 = vector.shape_cast %128 : vector<128xf32> to vector<1x128xf32>
    %130 = tpu.reciprocal %129 {approx = true} : vector<1x128xf32> -> vector<1x128xf32>
    %131 = vector.broadcast %130 : vector<1x128xf32> to vector<128x128xf32>
    %132 = arith.mulf %127, %131 : vector<128x128xf32>
    %133 = vector.broadcast %59 : vector<1x128xf32> to vector<128x128xf32>
    %134 = arith.mulf %133, %132 : vector<128x128xf32>
    %135 = arith.addf %120, %134 : vector<128x128xf32>
    %136 = arith.truncf %135 : vector<128x128xf32> to vector<128x128xbf16>
    %cst_49 = arith.constant dense<0.000000e+00> : vector<8x128xf32>
    %137 = tpu.matmul %104, %136, %cst_49 {dimension_numbers = #tpu.dot_dimension_numbers<[1], [0], [0], [1], [0, 0, 1, 1], [], []>} : vector<8x128xbf16>, vector<128x128xbf16>, vector<8x128xf32> -> vector<8x128xf32>
    %c8 = arith.constant 8 : index
    %c0_50 = arith.constant 0 : index
    %138 = vector.load %arg13[%c8, %c0_50] : memref<16x128xf32, #tpu.memory_space<vmem>>, vector<8x128xf32>
    tpu.vector_store %arg13[%c8, %c0_50], %137 {strides = array<i32>} : memref<16x128xf32, #tpu.memory_space<vmem>>, vector<8x128xf32>,
    %c0_51 = arith.constant 0 : index
    %c0_52 = arith.constant 0 : index
    %139 = vector.load %arg13[%c0_51, %c0_52] : memref<16x128xf32, #tpu.memory_space<vmem>>, vector<16x128xf32>
    %140 = arith.truncf %139 : vector<16x128xf32> to vector<16x128xbf16>
    %c0_53 = arith.constant 0 : index
    %c0_54 = arith.constant 0 : index
    %141 = vector.load %arg9[%c0_53, %c0_54] : memref<128x128xbf16, #tpu.memory_space<vmem>>, vector<128x128xbf16>
    %cst_55 = arith.constant dense<0.000000e+00> : vector<16x128xf32>
    %142 = tpu.matmul %140, %141, %cst_55 {dimension_numbers = #tpu.dot_dimension_numbers<[1], [0], [0], [1], [0, 0, 1, 1], [], []>} : vector<16x128xbf16>, vector<128x128xbf16>, vector<16x128xf32> -> vector<16x128xf32>
    %c0_56 = arith.constant 0 : index
    %c0_57 = arith.constant 0 : index
    %143 = vector.load %arg10[%c0_56, %c0_57] : memref<1x128xf32, #tpu.memory_space<vmem>>, vector<1x128xf32>
    %144 = vector.broadcast %143 : vector<1x128xf32> to vector<16x128xf32>
    %145 = arith.addf %142, %144 : vector<16x128xf32>
    %146 = arith.subf %36, %37 : vector<16x128xf32>
    %cst_58 = arith.constant 9.99999997E-7 : f32
    %147 = vector.broadcast %cst_58 : f32 to vector<16x128xf32>
    %148 = arith.addf %146, %147 : vector<16x128xf32>
    %149 = tpu.iota {dimensions = array<i32: 1>} : vector<1x128xi32>
    %c32_i32_59 = arith.constant 32 : i32
    %150 = vector.broadcast %c32_i32_59 : i32 to vector<1x128xi32>
    %151 = arith.cmpi slt, %149, %150 : vector<1x128xi32>
    %cst_60 = arith.constant 0.000000e+00 : f32
    %152 = vector.shape_cast %151 : vector<1x128xi1> to vector<1x128xi1>
    %153 = vector.broadcast %152 : vector<1x128xi1> to vector<16x128xi1>
    %154 = vector.broadcast %cst_60 : f32 to vector<16x128xf32>
    %155 = arith.select %153, %148, %154 : vector<16x128xi1>, vector<16x128xf32>
    %156 = arith.mulf %155, %155 : vector<16x128xf32>
    %cst_61 = arith.constant dense<0.000000e+00> : vector<16xf32>
    %157 = vector.multi_reduction <add>, %156, %cst_61 [1] : vector<16x128xf32> to vector<16xf32>
    %158 = vector.shape_cast %157 : vector<16xf32> to vector<16x1xf32>
    %159 = math.sqrt %158 : vector<16x1xf32>
    %160 = vector.broadcast %159 : vector<16x1xf32> to vector<16x128xf32>
    %161 = arith.mulf %145, %160 : vector<16x128xf32>
    %162 = vector.shape_cast %161 : vector<16x128xf32> to vector<2x8x128xf32>
    %c0_62 = arith.constant 0 : index
    %c0_63 = arith.constant 0 : index
    %c0_64 = arith.constant 0 : index
    %163 = vector.load %arg12[%c0_62, %c0_63, %c0_64] : memref<2x8x128xf32, #tpu.memory_space<vmem>>, vector<2x8x128xf32>
    tpu.vector_store %arg12[%c0_62, %c0_63, %c0_64], %162 {strides = array<i32>} : memref<2x8x128xf32, #tpu.memory_space<vmem>>, vector<2x8x128xf32>,
    return
  }
  func.func @transform_0(%arg0: i32) -> (i32, i32, i32) {
    %c0_i32 = arith.constant 0 : i32
    %c0_i32_0 = arith.constant 0 : i32
    %c0_i32_1 = arith.constant 0 : i32
    return %arg0, %c0_i32, %c0_i32_0 : i32, i32, i32
  }
  func.func @transform_1(%arg0: i32) -> (i32, i32, i32) {
    %c0_i32 = arith.constant 0 : i32
    %c0_i32_0 = arith.constant 0 : i32
    %c0_i32_1 = arith.constant 0 : i32
    return %arg0, %c0_i32, %c0_i32_0 : i32, i32, i32
  }
  func.func @transform_2(%arg0: i32) -> (i32, i32) {
    %c0_i32 = arith.constant 0 : i32
    %c0_i32_0 = arith.constant 0 : i32
    %c0_i32_1 = arith.constant 0 : i32
    return %c0_i32, %c0_i32_0 : i32, i32
  }
  func.func @transform_3(%arg0: i32) -> (i32, i32) {
    %c0_i32 = arith.constant 0 : i32
    %c0_i32_0 = arith.constant 0 : i32
    %c0_i32_1 = arith.constant 0 : i32
    return %c0_i32, %c0_i32_0 : i32, i32
  }
  func.func @transform_4(%arg0: i32) -> (i32, i32) {
    %c0_i32 = arith.constant 0 : i32
    %c0_i32_0 = arith.constant 0 : i32
    %c0_i32_1 = arith.constant 0 : i32
    return %c0_i32, %c0_i32_0 : i32, i32
  }
  func.func @transform_5(%arg0: i32) -> (i32, i32) {
    %c0_i32 = arith.constant 0 : i32
    %c0_i32_0 = arith.constant 0 : i32
    %c0_i32_1 = arith.constant 0 : i32
    return %c0_i32, %c0_i32_0 : i32, i32
  }
  func.func @transform_6(%arg0: i32) -> (i32, i32) {
    %c0_i32 = arith.constant 0 : i32
    %c0_i32_0 = arith.constant 0 : i32
    %c0_i32_1 = arith.constant 0 : i32
    return %c0_i32, %c0_i32_0 : i32, i32
  }
  func.func @transform_7(%arg0: i32) -> (i32, i32) {
    %c0_i32 = arith.constant 0 : i32
    %c0_i32_0 = arith.constant 0 : i32
    %c0_i32_1 = arith.constant 0 : i32
    return %c0_i32, %c0_i32_0 : i32, i32
  }
  func.func @transform_8(%arg0: i32) -> (i32, i32) {
    %c0_i32 = arith.constant 0 : i32
    %c0_i32_0 = arith.constant 0 : i32
    %c0_i32_1 = arith.constant 0 : i32
    return %c0_i32, %c0_i32_0 : i32, i32
  }
  func.func @transform_9(%arg0: i32) -> (i32, i32) {
    %c0_i32 = arith.constant 0 : i32
    %c0_i32_0 = arith.constant 0 : i32
    %c0_i32_1 = arith.constant 0 : i32
    return %c0_i32, %c0_i32_0 : i32, i32
  }
  func.func @transform_10(%arg0: i32) -> (i32, i32) {
    %c0_i32 = arith.constant 0 : i32
    %c0_i32_0 = arith.constant 0 : i32
    %c0_i32_1 = arith.constant 0 : i32
    return %c0_i32, %c0_i32_0 : i32, i32
  }
  func.func @transform_11(%arg0: i32) -> (i32, i32, i32) {
    %c0_i32 = arith.constant 0 : i32
    %c0_i32_0 = arith.constant 0 : i32
    %c0_i32_1 = arith.constant 0 : i32
    return %arg0, %c0_i32, %c0_i32_0 : i32, i32, i32
  }
}

</mosaic_0001>

<bundles_post_ra>
// kernel: tpu_custom_call.1
= control target key start
LH: loop header
LB: loop body
LE: loop exit
PB: predicated region body
PF: predicated region fallthrough
CT: control target
= control target key end

     0   :  { %16 = vsyncpa [#allocation4], 0  ;;  %s2382_s0 = inlined_call_operand.hbm [shape: f32[2,8,128], index: 0, kind: input, shape index: {}]   ;;  %s2383_s1 = inlined_call_operand.hbm [shape: f32[2,8,128], index: 1, kind: input, shape index: {}]   ;;  %s2384_s2 = inlined_call_operand.hbm [shape: bf16[128,128], index: 2, kind: input, shape index: {}]   ;;  %s2385_s3 = inlined_call_operand.vmem [shape: f32[1,128], index: 3, kind: input, shape index: {}]   ;;  %s2386_s4 = inlined_call_operand.hbm [shape: bf16[128,128], index: 4, kind: input, shape index: {}]   ;;  %s2387_s5 = inlined_call_operand.vmem [shape: f32[1,128], index: 5, kind: input, shape index: {}]   ;;  %s2388_s6 = inlined_call_operand.hbm [shape: bf16[128,128], index: 6, kind: input, shape index: {}]   ;;  %s2389_s7 = inlined_call_operand.vmem [shape: f32[1,128], index: 7, kind: input, shape index: {}]   ;;  %s2390_s8 = inlined_call_operand.hbm [shape: bf16[128,128], index: 8, kind: input, shape index: {}]   ;;  %s2391_s9 = inlined_call_operand.vmem [shape: f32[1,128], index: 9, kind: input, shape index: {}]   ;;  %s2392_s10 = inlined_call_operand.vmem [shape: f32[1,128], index: 10, kind: input, shape index: {}]   ;;  %s2393_s11 = inlined_call_operand.hbm [shape: f32[2,8,128], index: 11, kind: output, shape index: {}]  }
   0x1   :  { %17 = vsyncpa [#allocation7], 0 }
   0x2   :  { %18 = vsyncpa [#allocation10], 0 }
   0x3   :  { %19 = vsyncpa [#allocation13], 0 }
   0x4   :  { %20 = vsyncpa [#allocation5], 0  ;;  %s38_s19 = sshll.u32 %s2383_s1, 4  ;;  %s2043_s20 = smov [#allocation6]   ;;  %s39_s19 = int_to_ptr.hbm [resolvable:$true] %s38_s19 }
   0x5   :  { %s40_s21 = sshll.u32 %s2043_s20, 4  ;;  %s2044_s22 = smov 128   ;;  %s41_s21 = int_to_ptr.vmem [resolvable:$true] %s40_s21 }
   0x6   :  { %s2045_s23 = smov 8   ;;  %s66_s26 = sshll.u32 %s2386_s4, 4  ;;  %s67_s26 = int_to_ptr.hbm [resolvable:$true] %s66_s26 }
   0x7   :  { %46 = dma.hbm_to_vmem [thread:$0]  %s39_s19, 256, %s41_s21, [#allocation7], %s2044_s22, %s2044_s22, %s2045_s23  }
   0x8   :  { %s2046_s27 = smov [#allocation9]   ;;  %s25_s1 = sshll.u32 %s2382_s0, 4  ;;  %s26_s1 = int_to_ptr.hbm [resolvable:$true] %s25_s1 }
   0x9   :  { %s68_s28 = sshll.u32 %s2046_s27, 4  ;;  %s2047_s12 = smov 64   ;;  %s69_s28 = int_to_ptr.vmem [resolvable:$true] %s68_s28 }
   0xa   :  { %s2048_s13 = smov 4   ;;  %s51_s16 = sshll.u32 %s2384_s2, 4  ;;  %s52_s16 = int_to_ptr.hbm [resolvable:$true] %s51_s16 }
   0xb   :  { %74 = dma.hbm_to_vmem [thread:$0]  %s67_s26, 1024, %s69_s28, [#allocation10], %s2047_s12, %s2047_s12, %s2048_s13  }
   0xc   :  { %s2049_s17 = smov [#allocation3]   ;;  %s2050_s4 = smov [#allocation8]  }
   0xd   :  { %s27_s18 = sshll.u32 %s2049_s17, 4  ;;  %s53_s19 = sshll.u32 %s2050_s4, 4  ;;  %s28_s18 = int_to_ptr.vmem [resolvable:$true] %s27_s18  ;;  %s54_s19 = int_to_ptr.vmem [resolvable:$true] %s53_s19 }
   0xe   :  { %33 = dma.hbm_to_vmem [thread:$0]  %s26_s1, 256, %s28_s18, [#allocation4], %s2044_s22, %s2044_s22, %s2045_s23  }
   0xf   :  { %s81_s21 = sshll.u32 %s2388_s6, 4  ;;  %s96_s2 = sshll.u32 %s2390_s8, 4  ;;  %s82_s21 = int_to_ptr.hbm [resolvable:$true] %s81_s21  ;;  %s97_s2 = int_to_ptr.hbm [resolvable:$true] %s96_s2 }
  0x10   :  { %59 = dma.hbm_to_vmem [thread:$0]  %s52_s16, 1024, %s54_s19, [#allocation7], %s2047_s12, %s2047_s12, %s2048_s13  }
  0x11   :  { %s2051_s26 = smov [#allocation11]   ;;  %s2052_s28 = smov [#allocation12]  }
  0x12   :  { %s83_s27 = sshll.u32 %s2051_s26, 4  ;;  %s98_s29 = sshll.u32 %s2052_s28, 4  ;;  %s84_s27 = int_to_ptr.vmem [resolvable:$true] %s83_s27  ;;  %s99_s29 = int_to_ptr.vmem [resolvable:$true] %s98_s29 }
  0x13   :  { %89 = dma.hbm_to_vmem [thread:$0]  %s82_s21, 1024, %s84_s27, [#allocation10], %s2047_s12, %s2047_s12, %s2048_s13  }
  0x14   :  { %104 = dma.hbm_to_vmem [thread:$0]  %s97_s2, 1024, %s99_s29, [#allocation13], %s2047_s12, %s2047_s12, %s2048_s13  }
  0x15   :  { %2033 = dma.done.wait [#allocation4], 256  }
  0x16   :  { %2034 = vsyncadd [#allocation4], 4294967040 }
  0x17   :  { %2035 = dma.done.wait [#allocation7], 1280  }
  0x18   :  { %2036 = vsyncadd [#allocation7], 4294966016 }
  0x19   :  { %2037 = dma.done.wait [#allocation10], 2048  }
  0x1a   :  { %2038 = vsyncadd [#allocation10], 4294965248 }
  0x1b   :  { %2039 = dma.done.wait [#allocation13], 1024  }
  0x1c   :  { %2040 = vsyncadd [#allocation13], 4294966272  ;;  %v2053_v0 = vmov 8.0   ;;  %v1738_v2 = vld [vmem:[#allocation8 + $0x38] sm:$0xff]  ;;  %v1737_v4 = vld [vmem:[#allocation8 + $0x30] sm:$0xff]  ;;  %vm588_vm13 = vcmask 1043456  }
  0x1d   :  { %1799 = vrcp.f32 %v2053_v0  ;;  %326 = vmatpush.bf16.msra.mxu0 %v1738_v2  ;;  %v2139_v5 = vld [vmem:[#allocation3] sm:$0xff]  ;;  %v2141_v6 = vld [vmem:[#allocation3 + $0x8] sm:$0xff]  ;;  %v1734_v24 = vld [vmem:[#allocation8 + $0x18] sm:$0xff]  ;;  %vm563_vm14 = vcmask 64512   ;;  %s2054_s16 = smov [#allocation14]  }
  0x1e   :  { %v138_v7 = vrot.slane %v2139_v5, 4  ;;  %v144_v9 = vrot.slane %v2141_v6, 4  ;;  %v1736_v12 = vld [vmem:[#allocation8 + $0x28] sm:$0xff]  ;;  %v1735_v18 = vld [vmem:[#allocation8 + $0x20] sm:$0xff]  ;;  %v1733_v29 = vld [vmem:[#allocation8 + $0x10] sm:$0xff]  ;;  %s1569_s17 = sshll.u32 %s2054_s16, 4  ;;  %s1570_s17 = int_to_ptr.vmem [resolvable:$true] %s1569_s17 }
  0x1f   :  { %v1732_v34 = vld [vmem:[#allocation8 + $0x8] sm:$0xff]  ;;  %v1731_v39 = vld [vmem:[#allocation8] sm:$0xff] }
  0x20   :  { %v139_v10 = vadd.f32 %v138_v7, %v2139_v5  ;;  %v145_v13 = vadd.f32 %v144_v9, %v2141_v6  ;;  %v137_v7 = vld [vmem:[#allocation6 + $0x8] sm:$0xff] }
  0x21   :  { %327 = vmatpush.bf16.msra.mxu0 %v1737_v4  ;;  %v136_v4 = vld [vmem:[#allocation6] sm:$0xff]  ;;  %v207_v9 = vrot.slane %v137_v7, 4 }
  0x22   :  { %v140_v14 = vrot.slane %v139_v10, 2  ;;  %v146_v15 = vrot.slane %v145_v13, 2 }
  0x23   :  { %v1800_v1 = vpop.eup %1799 }
  0x24   :  { %v151_v3 = vmul.f32 8.0, %v1800_v1  ;;  %v141_v17 = vadd.f32 %v140_v14, %v139_v10  ;;  %vm155_vm0 = vweird.f32 %v1800_v1  ;;  %v147_v19 = vadd.f32 %v146_v15, %v145_v13 }
  0x25   :  { %328 = vmatpush.bf16.msra.mxu0 %v1736_v12 }
  0x26   :  { %v152_v8 = vsub.f32 1.0, %v151_v3  ;;  %v142_v20 = vrot.slane %v141_v17, 1  ;;  %v148_v21 = vrot.slane %v147_v19, 1 }
  0x28   :  { %v153_v11 = vmul.f32 %v1800_v1, %v152_v8  ;;  %v143_v23 = vadd.f32 %v142_v20, %v141_v17  ;;  %v149_v25 = vadd.f32 %v148_v21, %v147_v19  ;;  %v201_v8 = vrot.slane %v136_v4, 4 }
  0x29   :  { %329 = vmatpush.bf16.msra.mxu0 %v1735_v18 }
  0x2a   :  { %v154_v16 = vadd.f32 %v1800_v1, %v153_v11  ;;  %v202_v10 = vadd.f32 %v201_v8, %v136_v4  ;;  %v208_v11 = vadd.f32 %v207_v9, %v137_v7 }
  0x2c   :  { %v2147_v22 = vsel %vm155_vm0, %v1800_v1, %v154_v16  ;;  %v203_v12 = vrot.slane %v202_v10, 2  ;;  %v209_v13 = vrot.slane %v208_v11, 2 }
  0x2d   :  { %v157_v26 = vmul.f32 %v2147_v22, %v143_v23  ;;  %v158_v27 = vmul.f32 %v2147_v22, %v149_v25  ;;  %330 = vmatpush.bf16.msra.mxu0 %v1734_v24 }
  0x2e   :  { %v204_v14 = vadd.f32 %v203_v12, %v202_v10  ;;  %v210_v15 = vadd.f32 %v209_v13, %v208_v11 }
  0x2f   :  { %v159_v28 = vsub.f32 %v2139_v5, %v157_v26  ;;  %v160_v30 = vsub.f32 %v2141_v6, %v158_v27 }
  0x30   :  { %v205_v16 = vrot.slane %v204_v14, 1  ;;  %v211_v17 = vrot.slane %v210_v15, 1 }
  0x31   :  { %v161_v31 = vmul.f32 %v159_v28, %v159_v28  ;;  %v162_v32 = vmul.f32 %v160_v30, %v160_v30  ;;  %331 = vmatpush.bf16.msra.mxu0 %v1733_v29  ;;  %v1746_v29 = vld [vmem:[#allocation9 + $0x38] sm:$0xff] }
  0x32   :  { %v206_v18 = vadd.f32 %v205_v16, %v204_v14  ;;  %v212_v19 = vadd.f32 %v211_v17, %v210_v15  ;;  %411 = vmatpush.bf16.msra.mxu1 %v1746_v29  ;;  %v1750_v16 = vld [vmem:[#allocation11 + $0x18] sm:$0xff]  ;;  %v1749_v17 = vld [vmem:[#allocation11 + $0x10] sm:$0xff] }
  0x33   :  { %v163_v33 = vrot.slane %v161_v31, 4  ;;  %v169_v35 = vrot.slane %v162_v32, 4 }
  0x34   :  { %v213_v20 = vmul.f32 %v206_v18, %v2147_v22  ;;  %v214_v21 = vmul.f32 %v212_v19, %v2147_v22  ;;  %v1748_v18 = vld [vmem:[#allocation11 + $0x8] sm:$0xff]  ;;  %v1795_v19 = vld [vmem:[%s2387_s5] ss:$0 sm:$0xff] }
  0x35   :  { %v164_v36 = vadd.f32 %v163_v33, %v161_v31  ;;  %v170_v37 = vadd.f32 %v169_v35, %v162_v32  ;;  %332 = vmatpush.bf16.msra.mxu0 %v1732_v34  ;;  %v1745_v32 = vld [vmem:[#allocation9 + $0x30] sm:$0xff] }
  0x36   :  { %v2155_v23 = vsub.f32 %v136_v4, %v213_v20  ;;  %v2157_v24 = vsub.f32 %v137_v7, %v214_v21  ;;  %412 = vmatpush.bf16.msra.mxu1 %v1745_v32 }
  0x37   :  { %v165_v38 = vrot.slane %v164_v36, 2  ;;  %v171_v40 = vrot.slane %v170_v37, 2 }
  0x38   :  { %v217_v25 = vmul.f32 %v2155_v23, %v2155_v23  ;;  %v218_v26 = vmul.f32 %v2157_v24, %v2157_v24 }
  0x39   :  { %v166_v41 = vadd.f32 %v165_v38, %v164_v36  ;;  %v172_v42 = vadd.f32 %v171_v40, %v170_v37  ;;  %333 = vmatpush.bf16.msra.mxu0 %v1731_v39  ;;  %v1744_v36 = vld [vmem:[#allocation9 + $0x28] sm:$0xff]  ;;  %v1754_v37 = vld [vmem:[#allocation11 + $0x38] sm:$0xff]  ;;  %v1753_v40 = vld [vmem:[#allocation11 + $0x30] sm:$0xff] }
  0x3a   :  { %v219_v27 = vrot.slane %v217_v25, 4  ;;  %496 = vmatpush.bf16.msra.mxu2 %v1754_v37  ;;  %413 = vmatpush.bf16.msra.mxu1 %v1744_v36 }
  0x3b   :  { %v167_v43 = vrot.slane %v166_v41, 1  ;;  %v173_v44 = vrot.slane %v172_v42, 1 }
  0x3d   :  { %v168_v45 = vadd.f32 %v167_v43, %v166_v41  ;;  %v174_v46 = vadd.f32 %v173_v44, %v172_v42  ;;  %v1743_v43 = vld [vmem:[#allocation9 + $0x20] sm:$0xff] }
  0x3e   :  { %497 = vmatpush.bf16.msra.mxu2 %v1753_v40  ;;  %414 = vmatpush.bf16.msra.mxu1 %v1743_v43 }
  0x3f   :  { %v175_v47 = vmul.f32 0.14285715, %v168_v45  ;;  %v176_v48 = vmul.f32 0.14285715, %v174_v46  ;;  %v1752_v46 = vld [vmem:[#allocation11 + $0x28] sm:$0xff] }
  0x41   :  { %v177_v49 = vadd.f32 1e-05, %v175_v47  ;;  %v178_v50 = vadd.f32 1e-05, %v176_v48 }
  0x42   :  { %498 = vmatpush.bf16.msra.mxu2 %v1752_v46 }
  0x43   :  { %1801 = vrsqrt.f32 %v177_v49  ;;  %vm185_vm1 = vweird.f32 %v177_v49  ;;  %vm195_vm3 = vweird.f32 %v178_v50 }
  0x44   :  { %1803 = vrsqrt.f32 %v178_v50 }
  0x49   :  { %v1802_v51 = vpop.eup %1801 }
  0x4a   :  { %v1804_v52 = vpop.eup %1803  ;;  %v180_v53 = vmul.f32 %v1802_v51, %v177_v49  ;;  %vm186_vm2 = vweird.f32 %v1802_v51  ;;  %v1742_v49 = vld [vmem:[#allocation9 + $0x18] sm:$0xff] }
  0x4b   :  { %v190_v54 = vmul.f32 %v1804_v52, %v178_v50  ;;  %vm196_vm4 = vweird.f32 %v1804_v52  ;;  %vm187_vm5 = vmor %vm185_vm1, %vm186_vm2  ;;  %v1751_v50 = vld [vmem:[#allocation11 + $0x20] sm:$0xff]  ;;  %415 = vmatpush.bf16.msra.mxu1 %v1742_v49 }
  0x4c   :  { %v181_v55 = vmul.f32 %v1802_v51, %v180_v53  ;;  %vm197_vm6 = vmor %vm195_vm3, %vm196_vm4  ;;  %499 = vmatpush.bf16.msra.mxu2 %v1751_v50 }
  0x4d   :  { %v191_v56 = vmul.f32 %v1804_v52, %v190_v54 }
  0x4e   :  { %v182_v57 = vmul.f32 0.5, %v181_v55  ;;  %v1794_v55 = vld [vmem:[%s2385_s3] ss:$0 sm:$0xff] }
  0x4f   :  { %v192_v58 = vmul.f32 0.5, %v191_v56  ;;  %v1740_v56 = vld [vmem:[#allocation9 + $0x8] sm:$0xff] }
  0x50   :  { %v183_v59 = vsub.f32 1.5, %v182_v57  ;;  %500 = vmatpush.bf16.msra.mxu2 %v1750_v16 }
  0x51   :  { %v193_v60 = vsub.f32 1.5, %v192_v58 }
  0x52   :  { %v184_v61 = vmul.f32 %v1802_v51, %v183_v59 }
  0x53   :  { %v194_v62 = vmul.f32 %v1804_v52, %v193_v60 }
  0x54   :  { %v188_v63 = vsel %vm187_vm5, %v1802_v51, %v184_v61  ;;  %v1741_v51 = vld [vmem:[#allocation9 + $0x10] sm:$0xff]  ;;  %501 = vmatpush.bf16.msra.mxu2 %v1749_v17 }
  0x55   :  { %v198_v0 = vsel %vm197_vm6, %v1804_v52, %v194_v62  ;;  %v199_v1 = vmul.f32 %v188_v63, %v159_v28  ;;  %v225_v28 = vrot.slane %v218_v26, 4  ;;  %416 = vmatpush.bf16.msra.mxu1 %v1741_v51  ;;  %v1739_v62 = vld [vmem:[#allocation9] sm:$0xff] }
  0x56   :  { %v200_v2 = vmul.f32 %v198_v0, %v160_v30  ;;  %v220_v30 = vadd.f32 %v219_v27, %v217_v25  ;;  %v1747_v27 = vld [vmem:[#allocation11] sm:$0xff] }
  0x57   :  { %v226_v31 = vadd.f32 %v225_v28, %v218_v26 }
  0x58   :  { %v257_v3 = vpack.c.bf16 %v200_v2, %v199_v1  ;;  %v221_v33 = vrot.slane %v220_v30, 2  ;;  %502 = vmatpush.bf16.msra.mxu2 %v1748_v18 }
  0x59   :  { %v227_v34 = vrot.slane %v226_v31, 2  ;;  %417 = vmatpush.bf16.msra.mxu1 %v1740_v56 }
  0x5a   :  { %334 = vmatmul.bf16.vlgmr.msra.gmra.mxu0 %v257_v3  ;;  %v222_v22 = vadd.f32 %v221_v33, %v220_v30 }
  0x5b   :  { %v228_v35 = vadd.f32 %v227_v34, %v226_v31  ;;  %v427_v34 = vpack.c.bf16 %v2141_v6, %v2139_v5 }
  0x5c   :  { %v223_v38 = vrot.slane %v222_v22, 1  ;;  %503 = vmatpush.bf16.msra.mxu2 %v1747_v27 }
  0x5d   :  { %v229_v39 = vrot.slane %v228_v35, 1  ;;  %418 = vmatpush.bf16.msra.mxu1 %v1739_v62 }
  0x5e   :  { %v224_v41 = vadd.f32 %v223_v38, %v222_v22 }
  0x5f   :  { %v230_v42 = vadd.f32 %v229_v39, %v228_v35  ;;  %504 = vmatmul.bf16.vlgmr.msra.gmra.mxu2 %v427_v34 }
  0x60   :  { %v231_v44 = vmul.f32 0.14285715, %v224_v41 }
  0x61   :  { %v232_v45 = vmul.f32 0.14285715, %v230_v42 }
  0x62   :  { %v233_v47 = vadd.f32 1e-05, %v231_v44 }
  0x63   :  { %v234_v48 = vadd.f32 1e-05, %v232_v45 }
  0x64   :  { %1805 = vrsqrt.f32 %v233_v47  ;;  %vm241_vm7 = vweird.f32 %v233_v47 }
  0x65   :  { %1807 = vrsqrt.f32 %v234_v48  ;;  %vm251_vm9 = vweird.f32 %v234_v48 }
  0x6a   :  { %v1806_v53 = vpop.eup %1805 }
  0x6b   :  { %v1808_v54 = vpop.eup %1807  ;;  %v236_v57 = vmul.f32 %v1806_v53, %v233_v47  ;;  %vm242_vm8 = vweird.f32 %v1806_v53 }
  0x6c   :  { %v246_v58 = vmul.f32 %v1808_v54, %v234_v48  ;;  %vm252_vm10 = vweird.f32 %v1808_v54  ;;  %vm243_vm11 = vmor %vm241_vm7, %vm242_vm8 }
  0x6d   :  { %v237_v59 = vmul.f32 %v1806_v53, %v236_v57  ;;  %vm253_vm12 = vmor %vm251_vm9, %vm252_vm10 }
  0x6e   :  { %v247_v60 = vmul.f32 %v1808_v54, %v246_v58 }
  0x6f   :  { %v238_v63 = vmul.f32 0.5, %v237_v59 }
  0x70   :  { %v248_v1 = vmul.f32 0.5, %v247_v60 }
  0x71   :  { %v239_v3 = vsub.f32 1.5, %v238_v63 }
  0x72   :  { %v249_v4 = vsub.f32 1.5, %v248_v1 }
  0x73   :  { %v240_v9 = vmul.f32 %v1806_v53, %v239_v3 }
  0x74   :  { %v250_v10 = vmul.f32 %v1808_v54, %v249_v4 }
  0x75   :  { %v244_v11 = vsel %vm243_vm11, %v1806_v53, %v240_v9 }
  0x76   :  { %v254_v12 = vsel %vm253_vm12, %v1808_v54, %v250_v10  ;;  %v255_v13 = vmul.f32 %v244_v11, %v2155_v23 }
  0x77   :  { %v256_v14 = vmul.f32 %v254_v12, %v2157_v24 }
  0x79   :  { %v342_v15 = vpack.c.bf16 %v256_v14, %v255_v13 }
  0x7b   :  { %419 = vmatmul.bf16.vlgmr.msra.gmra.mxu1 %v342_v15 }
  0xd7   :  { %v335_v52 = vpop.f32.mrf.mxu0 }
  0xd8   :  { %v336_v61 = vadd.f32 %v1794_v55, %v335_v52 }
  0xda   :  { %v340_v7 = vpack.c.bf16 %v336_v61, %v336_v61 }
  0xdf   :  { %v337_v0 = vpop.f32.mrf.mxu0 }
  0xe0   :  { %v338_v2 = vadd.f32 %v1794_v55, %v337_v0 }
  0xe2   :  { %v341_v8 = vpack.c.bf16 %v338_v2, %v338_v2 }
  0xe4   :  { %1777 = vxpose.binary.xlu0.c.b16.start.end [1/2] (short) %v341_v8, %v340_v7, 128 }
  0xf8   :  { %v420_v20 = vpop.f32.mrf.mxu1 }
  0xf9   :  { %v421_v21 = vadd.f32 %v1795_v19, %v420_v20 }
  0xfb   :  { %v425_v25 = vpack.c.bf16 %v421_v21, %v421_v21 }
  0xfd   :  { %v590_v26 = vsel %vm588_vm13, %v425_v25, 0 }
  0xfe   :  { %599 = vmatpush.bf16.msra.mxu3 %v590_v26 }
 0x100   :  { %v422_v23 = vpop.f32.mrf.mxu1 }
 0x101   :  { %v423_v24 = vadd.f32 %v1795_v19, %v422_v23 }
 0x103   :  { %v426_v28 = vpack.c.bf16 %v423_v24, %v423_v24 }
 0x105   :  { %v1036_v29 = vsel %vm588_vm13, %v426_v28, 0 }
 0x106   :  { %1045 = vmatpush.bf16.msrb.mxu1 %v1036_v29  ;;  %1763 = vmatpush.bf16.msrb.mxu2 %v1036_v29 }
 0x190   :  { %v1778_v30 = vpop.trf.xlu0 }
 0x191   :  { %1683 = vmatmul.msk.bf16.vlgmr.msra.gmra.mxu3 %vm563_vm14, %v1778_v30 }
 0x198   :  { %v1779_v31 = vpop.trf.xlu0 }
 0x199   :  { %1691 = vmatmul.msk.bf16.vlgmr.msrb.gmra.mxu1 %vm563_vm14, %v1779_v31 }
 0x1a0   :  { %v1780_v32 = vpop.trf.xlu0 }
 0x1a1   :  { %1684 = vmatmul.msk.bf16.gmra.mxu3 %vm563_vm14, %v1780_v32 }
 0x1a8   :  { %v1781_v33 = vpop.trf.xlu0 }
 0x1a9   :  { %1692 = vmatmul.msk.bf16.gmra.mxu1 %vm563_vm14, %v1781_v33 }
 0x1b0   :  { %v1782_v22 = vpop.trf.xlu0 }
 0x1b1   :  { %1685 = vmatmul.msk.bf16.gmra.mxu3 %vm563_vm14, %v1782_v22 }
 0x1b8   :  { %v1783_v35 = vpop.trf.xlu0 }
 0x1b9   :  { %1693 = vmatmul.msk.bf16.gmra.mxu1 %vm563_vm14, %v1783_v35 }
 0x1c0   :  { %v1784_v36 = vpop.trf.xlu0 }
 0x1c1   :  { %1686 = vmatmul.msk.bf16.gmra.mxu3 %vm563_vm14, %v1784_v36 }
 0x1c8   :  { %v1785_v37 = vpop.trf.xlu0 }
 0x1c9   :  { %1694 = vmatmul.msk.bf16.gmra.mxu1 %vm563_vm14, %v1785_v37 }
 0x1d0   :  { %v1786_v38 = vpop.trf.xlu0 }
 0x1d1   :  { %1687 = vmatmul.msk.bf16.gmra.mxu3 %vm563_vm14, %v1786_v38 }
 0x1d8   :  { %v1787_v39 = vpop.trf.xlu0 }
 0x1d9   :  { %1695 = vmatmul.msk.bf16.gmra.mxu1 %vm563_vm14, %v1787_v39 }
 0x1e0   :  { %v1788_v5 = vpop.trf.xlu0 }
 0x1e1   :  { %1688 = vmatmul.msk.bf16.gmra.mxu3 %vm563_vm14, %v1788_v5 }
 0x1e8   :  { %v1789_v6 = vpop.trf.xlu0 }
 0x1e9   :  { %1696 = vmatmul.msk.bf16.vlgmr.msrb.gmra.mxu2 %vm563_vm14, %v1789_v6 }
 0x1f0   :  { %v1790_v40 = vpop.trf.xlu0 }
 0x1f1   :  { %1689 = vmatmul.msk.bf16.gmra.mxu3 %vm563_vm14, %v1790_v40 }
 0x1f8   :  { %v1791_v41 = vpop.trf.xlu0 }
 0x1f9   :  { %1697 = vmatmul.msk.bf16.gmra.mxu2 %vm563_vm14, %v1791_v41 }
 0x200   :  { %v1792_v42 = vpop.trf.xlu0 }
 0x201   :  { %1690 = vmatmul.msk.bf16.gmra.mxu3 %vm563_vm14, %v1792_v42 }
 0x208   :  { %v1793_v43 = vpop.trf.xlu0 }
 0x209   :  { %1698 = vmatmul.msk.bf16.gmra.mxu2 %vm563_vm14, %v1793_v43 }
 0x214   :  { %v2189_v44 = vpop.f32.mrf.mxu3 }
 0x215   :  { %641 = vxpose.xlu1.b32.start [1/16] (narrow) %v2189_v44, 32  ;;  %v831_v46 = vmax.f32 %v2189_v44, -1e+30 }
 0x216   :  { %v2192_v45 = vpop.f32.mrf.mxu1 }
 0x217   :  { %1087 = vxpose.xlu0.b32.start [1/16] (narrow) %v2192_v45, 32  ;;  %v1274_v47 = vmax.f32 %v2192_v45, -1e+30  ;;  %v835_v49 = vmax.f32 %v831_v46, -1e+30 }
 0x219   :  { %v1278_v51 = vmax.f32 %v1274_v47, -1e+30  ;;  %v839_v55 = vmax.f32 %v835_v49, -1e+30 }
 0x21b   :  { %v1282_v58 = vmax.f32 %v1278_v51, -1e+30 }
 0x21c   :  { %v2197_v48 = vpop.f32.mrf.mxu3 }
 0x21d   :  { %v832_v50 = vmax.f32 %v2197_v48, -1e+30  ;;  %642 = vxpose.xlu1.b32.cont [2/16] (narrow) %v2197_v48, 32 }
 0x21e   :  { %v2201_v52 = vpop.f32.mrf.mxu1 }
 0x21f   :  { %v836_v53 = vmax.f32 %v832_v50, -1e+30  ;;  %v1275_v54 = vmax.f32 %v2201_v52, -1e+30  ;;  %1088 = vxpose.xlu0.b32.cont [2/16] (narrow) %v2201_v52, 32 }
 0x221   :  { %v840_v56 = vmax.f32 %v836_v53, -1e+30  ;;  %v1279_v57 = vmax.f32 %v1275_v54, -1e+30 }
 0x223   :  { %v843_v59 = vmax.f32 %v839_v55, %v840_v56  ;;  %v1283_v60 = vmax.f32 %v1279_v57, -1e+30 }
 0x224   :  { %v606_v61 = vpop.f32.mrf.mxu3 }
 0x225   :  { %v1286_v62 = vmax.f32 %v1282_v58, %v1283_v60  ;;  %643 = vxpose.xlu1.b32.cont [3/16] (narrow) %v606_v61, 32  ;;  %v833_v0 = vmax.f32 %v606_v61, -1e+30 }
 0x226   :  { %v2205_v63 = vpop.f32.mrf.mxu1 }
 0x227   :  { %1089 = vxpose.xlu0.b32.cont [3/16] (narrow) %v2205_v63, 32  ;;  %v1276_v1 = vmax.f32 %v2205_v63, -1e+30  ;;  %v837_v3 = vmax.f32 %v833_v0, -1e+30 }
 0x229   :  { %v1280_v7 = vmax.f32 %v1276_v1, -1e+30  ;;  %v841_v11 = vmax.f32 %v837_v3, -1e+30 }
 0x22b   :  { %v1284_v14 = vmax.f32 %v1280_v7, -1e+30 }
 0x22c   :  { %v608_v2 = vpop.f32.mrf.mxu3 }
 0x22d   :  { %v834_v4 = vmax.f32 %v608_v2, -1e+30  ;;  %644 = vxpose.xlu1.b32.cont [4/16] (narrow) %v608_v2, 32 }
 0x22e   :  { %v2209_v8 = vpop.f32.mrf.mxu1 }
 0x22f   :  { %v838_v9 = vmax.f32 %v834_v4, -1e+30  ;;  %v1277_v10 = vmax.f32 %v2209_v8, -1e+30  ;;  %1090 = vxpose.xlu0.b32.cont [4/16] (narrow) %v2209_v8, 32 }
 0x231   :  { %v842_v12 = vmax.f32 %v838_v9, -1e+30  ;;  %v1281_v13 = vmax.f32 %v1277_v10, -1e+30 }
 0x233   :  { %v844_v15 = vmax.f32 %v841_v11, %v842_v12  ;;  %v1285_v16 = vmax.f32 %v1281_v13, -1e+30 }
 0x234   :  { %v611_v17 = vpop.f32.mrf.mxu3 }
 0x235   :  { %v845_v18 = vmax.f32 %v843_v59, %v844_v15  ;;  %v1287_v19 = vmax.f32 %v1284_v14, %v1285_v16  ;;  %645 = vxpose.xlu1.b32.cont [5/16] (narrow) %v611_v17, 32 }
 0x236   :  { %v1057_v20 = vpop.f32.mrf.mxu1 }
 0x237   :  { %v846_v21 = vrot.slane %v845_v18, 4  ;;  %v1288_v25 = vmax.f32 %v1286_v62, %v1287_v19  ;;  %1091 = vxpose.xlu0.b32.cont [5/16] (narrow) %v1057_v20, 32 }
 0x239   :  { %v847_v26 = vmax.f32 %v845_v18, %v846_v21  ;;  %v1289_v23 = vrot.slane %v1288_v25, 4  ;;  %v2251_v18 = vpop.f32.mrf.mxu2 }
 0x23b   :  { %v848_v24 = vrot.slane %v847_v26, 2  ;;  %v1290_v27 = vmax.f32 %v1288_v25, %v1289_v23 }
 0x23c   :  { %v613_v28 = vpop.f32.mrf.mxu3 }
 0x23d   :  { %v849_v29 = vmax.f32 %v847_v26, %v848_v24  ;;  %v1291_v30 = vrot.slane %v1290_v27, 2  ;;  %646 = vxpose.xlu1.b32.cont [6/16] (narrow) %v613_v28, 32 }
 0x23e   :  { %v1059_v31 = vpop.f32.mrf.mxu1 }
 0x23f   :  { %v850_v32 = vrot.slane %v849_v29, 1  ;;  %v1292_v33 = vmax.f32 %v1290_v27, %v1291_v30  ;;  %1092 = vxpose.xlu0.b32.cont [6/16] (narrow) %v1059_v31, 32 }
 0x241   :  { %v851_v34 = vmax.f32 %v849_v29, %v850_v32  ;;  %v1293_v22 = vrot.slane %v1292_v33, 1  ;;  %v2263_v32 = vpop.f32.mrf.mxu2 }
 0x243   :  { %v852_v35 = vsub.f32 %v2189_v44, %v851_v34  ;;  %v853_v36 = vsub.f32 %v2197_v48, %v851_v34  ;;  %v854_v37 = vsub.f32 %v606_v61, %v851_v34  ;;  %v855_v38 = vsub.f32 %v608_v2, %v851_v34 }
 0x244   :  { %v1294_v39 = vmax.f32 %v1292_v33, %v1293_v22  ;;  %v616_v5 = vpop.f32.mrf.mxu3  ;;  %v856_v41 = vsub.f32 -1e+30, %v851_v34 }
 0x245   :  { %v868_v6 = vmul.f32 1.442695, %v852_v35  ;;  %v870_v40 = vmul.f32 1.442695, %v853_v36  ;;  %v872_v42 = vmul.f32 1.442695, %v854_v37 }
 0x246   :  { %v1295_v43 = vsub.f32 %v2192_v45, %v1294_v39  ;;  %v1296_v46 = vsub.f32 %v2201_v52, %v1294_v39  ;;  %647 = vxpose.xlu1.b32.cont [7/16] (narrow) %v616_v5, 32  ;;  %v1062_v47 = vpop.f32.mrf.mxu1  ;;  %v874_v49 = vmul.f32 1.442695, %v855_v38  ;;  %v1297_v44 = vsub.f32 %v2205_v63, %v1294_v39 }
 0x247   :  { %1809 = vpow2.f32 %v868_v6  ;;  %v1298_v48 = vsub.f32 %v2209_v8, %v1294_v39  ;;  %1093 = vxpose.xlu0.b32.cont [7/16] (narrow) %v1062_v47, 32  ;;  %v876_v53 = vmul.f32 1.442695, %v856_v41  ;;  %v1299_v54 = vsub.f32 -1e+30, %v1294_v39 }
 0x248   :  { %1811 = vpow2.f32 %v870_v40  ;;  %v1311_v50 = vmul.f32 1.442695, %v1295_v43  ;;  %v1313_v51 = vmul.f32 1.442695, %v1296_v46  ;;  %v1315_v55 = vmul.f32 1.442695, %v1297_v44 }
 0x249   :  { %1813 = vpow2.f32 %v872_v42  ;;  %v1317_v56 = vmul.f32 1.442695, %v1298_v48  ;;  %v1319_v60 = vmul.f32 1.442695, %v1299_v54 }
 0x24a   :  { %1815 = vpow2.f32 %v874_v49 }
 0x24b   :  { %1817 = vpow2.f32 %v1311_v50 }
 0x24c   :  { %v618_v45 = vpop.f32.mrf.mxu3  ;;  %1819 = vpow2.f32 %v1313_v51 }
 0x24d   :  { %v2219_v52 = vpop.eup %1809  ;;  %1821 = vpow2.f32 %v876_v53 }
 0x24e   :  { %v2221_v57 = vpop.eup %1811  ;;  %648 = vxpose.xlu1.b32.cont [8/16] (narrow) %v618_v45, 32  ;;  %v1064_v58 = vpop.f32.mrf.mxu1  ;;  %1823 = vpow2.f32 %v1315_v55 }
 0x24f   :  { %v900_v59 = vadd.f32 %v2221_v57, %v2219_v52  ;;  %1094 = vxpose.xlu0.b32.cont [8/16] (narrow) %v1064_v58, 32  ;;  %v2225_v61 = vpop.eup %1813  ;;  %1825 = vpow2.f32 %v1317_v56 }
 0x250   :  { %v2227_v62 = vpop.eup %1815  ;;  %1827 = vpow2.f32 %v1319_v60 }
 0x251   :  { %v901_v63 = vadd.f32 %v2225_v61, %v900_v59  ;;  %v2230_v0 = vpop.eup %1817 }
 0x252   :  { %v2232_v1 = vpop.eup %1819 }
 0x253   :  { %v902_v2 = vadd.f32 %v2227_v62, %v901_v63  ;;  %v2235_v3 = vpop.eup %1821  ;;  %v1343_v4 = vadd.f32 %v2232_v1, %v2230_v0 }
 0x254   :  { %v621_v7 = vpop.f32.mrf.mxu3  ;;  %v2239_v8 = vpop.eup %1823 }
 0x255   :  { %v903_v9 = vadd.f32 %v2235_v3, %v902_v2  ;;  %v1344_v10 = vadd.f32 %v2239_v8, %v1343_v4  ;;  %v2243_v12 = vpop.eup %1825 }
 0x256   :  { %649 = vxpose.xlu1.b32.cont [9/16] (narrow) %v621_v7, 32  ;;  %v1067_v11 = vpop.f32.mrf.mxu1  ;;  %v2247_v15 = vpop.eup %1827 }
 0x257   :  { %v904_v13 = vadd.f32 %v2235_v3, %v903_v9  ;;  %1095 = vxpose.xlu0.b32.cont [9/16] (narrow) %v1067_v11, 32  ;;  %v1345_v14 = vadd.f32 %v2243_v12, %v1344_v10 }
 0x259   :  { %v905_v16 = vadd.f32 %v2235_v3, %v904_v13  ;;  %v1346_v17 = vadd.f32 %v2247_v15, %v1345_v14 }
 0x25b   :  { %v906_v19 = vadd.f32 %v2235_v3, %v905_v16  ;;  %v1347_v20 = vadd.f32 %v2247_v15, %v1346_v17 }
 0x25c   :  { %v623_v21 = vpop.f32.mrf.mxu3 }
 0x25d   :  { %v907_v25 = vadd.f32 %v2235_v3, %v906_v19  ;;  %v1348_v26 = vadd.f32 %v2247_v15, %v1347_v20 }
 0x25e   :  { %650 = vxpose.xlu1.b32.cont [10/16] (narrow) %v623_v21, 32  ;;  %v1069_v23 = vpop.f32.mrf.mxu1 }
 0x25f   :  { %v908_v24 = vadd.f32 %v2235_v3, %v907_v25  ;;  %1096 = vxpose.xlu0.b32.cont [10/16] (narrow) %v1069_v23, 32  ;;  %v1349_v27 = vadd.f32 %v2247_v15, %v1348_v26 }
 0x261   :  { %v909_v28 = vadd.f32 %v2235_v3, %v908_v24  ;;  %v1350_v29 = vadd.f32 %v2247_v15, %v1349_v27 }
 0x263   :  { %v910_v30 = vadd.f32 %v2235_v3, %v909_v28  ;;  %v1351_v31 = vadd.f32 %v2247_v15, %v1350_v29 }
 0x264   :  { %v626_v33 = vpop.f32.mrf.mxu3 }
 0x265   :  { %v911_v34 = vadd.f32 %v2235_v3, %v910_v30  ;;  %v1352_v22 = vadd.f32 %v2247_v15, %v1351_v31 }
 0x266   :  { %651 = vxpose.xlu1.b32.cont [11/16] (narrow) %v626_v33, 32 }
 0x267   :  { %v912_v35 = vadd.f32 %v2235_v3, %v911_v34  ;;  %v1353_v36 = vadd.f32 %v2247_v15, %v1352_v22 }
 0x269   :  { %v913_v37 = vadd.f32 %v2235_v3, %v912_v35  ;;  %v1354_v38 = vadd.f32 %v2247_v15, %v1353_v36 }
 0x26b   :  { %v914_v39 = vadd.f32 %v2235_v3, %v913_v37  ;;  %v1355_v5 = vadd.f32 %v2247_v15, %v1354_v38 }
 0x26c   :  { %v628_v6 = vpop.f32.mrf.mxu3  ;;  %v1072_v40 = vpop.f32.mrf.mxu2 }
 0x26d   :  { %v915_v41 = vrot.slane %v914_v39, 4  ;;  %1097 = vxpose.xlu0.b32.cont [11/16] (narrow) %v1072_v40, 32  ;;  %v1356_v42 = vadd.f32 %v2247_v15, %v1355_v5 }
 0x26e   :  { %652 = vxpose.xlu1.b32.cont [12/16] (narrow) %v628_v6, 32 }
 0x26f   :  { %v916_v43 = vadd.f32 %v915_v41, %v914_v39  ;;  %v1357_v46 = vadd.f32 %v2247_v15, %v1356_v42 }
 0x271   :  { %v917_v47 = vrot.slane %v916_v43, 2  ;;  %v1358_v49 = vrot.slane %v1357_v46, 4 }
 0x273   :  { %v918_v44 = vadd.f32 %v917_v47, %v916_v43  ;;  %v1359_v48 = vadd.f32 %v1358_v49, %v1357_v46 }
 0x274   :  { %v631_v50 = vpop.f32.mrf.mxu3  ;;  %v1074_v51 = vpop.f32.mrf.mxu2 }
 0x275   :  { %v919_v53 = vrot.slane %v918_v44, 1  ;;  %1098 = vxpose.xlu0.b32.cont [12/16] (narrow) %v1074_v51, 32  ;;  %v1360_v54 = vrot.slane %v1359_v48, 2 }
 0x276   :  { %653 = vxpose.xlu1.b32.cont [13/16] (narrow) %v631_v50, 32 }
 0x277   :  { %v920_v55 = vadd.f32 %v919_v53, %v918_v44  ;;  %v1361_v45 = vadd.f32 %v1360_v54, %v1359_v48 }
 0x279   :  { %1829 = vrcp.f32 %v920_v55  ;;  %v1362_v56 = vrot.slane %v1361_v45, 1 }
 0x27b   :  { %v1363_v58 = vadd.f32 %v1362_v56, %v1361_v45 }
 0x27c   :  { %v633_v59 = vpop.f32.mrf.mxu3  ;;  %v1077_v60 = vpop.f32.mrf.mxu2 }
 0x27d   :  { %1099 = vxpose.xlu0.b32.cont [13/16] (narrow) %v1077_v60, 32  ;;  %1831 = vrcp.f32 %v1363_v58 }
 0x27e   :  { %654 = vxpose.xlu1.b32.cont [14/16] (narrow) %v633_v59, 32 }
 0x27f   :  { %v1830_v63 = vpop.eup %1829 }
 0x280   :  { %v2276_v2 = vmul.f32 %v1830_v63, %v2235_v3  ;;  %v2279_v4 = vmul.f32 %v1830_v63, %v2225_v61  ;;  %v2282_v7 = vmul.f32 %v1830_v63, %v2227_v62  ;;  %v2285_v9 = vmul.f32 %v1830_v63, %v2219_v52 }
 0x281   :  { %v2288_v10 = vmul.f32 %v1830_v63, %v2221_v57 }
 0x283   :  { %v1832_v11 = vpop.eup %1831 }
 0x284   :  { %v636_v13 = vpop.f32.mrf.mxu3  ;;  %v1079_v14 = vpop.f32.mrf.mxu2  ;;  %v2291_v16 = vmul.f32 %v1832_v11, %v2247_v15  ;;  %v2294_v3 = vmul.f32 %v1832_v11, %v2239_v8  ;;  %v2297_v61 = vmul.f32 %v1832_v11, %v2243_v12  ;;  %v2300_v62 = vmul.f32 %v1832_v11, %v2230_v0 }
 0x285   :  { %1100 = vxpose.xlu0.b32.cont [14/16] (narrow) %v1079_v14, 32  ;;  %v2303_v52 = vmul.f32 %v1832_v11, %v2232_v1 }
 0x286   :  { %655 = vxpose.xlu1.b32.cont [15/16] (narrow) %v636_v13, 32 }
 0x28c   :  { %v638_v57 = vpop.f32.mrf.mxu3  ;;  %v1082_v17 = vpop.f32.mrf.mxu2 }
 0x28d   :  { %1101 = vxpose.xlu0.b32.cont [15/16] (narrow) %v1082_v17, 32 }
 0x28e   :  { %656 = vxpose.xlu1.b32.end [16/16] (narrow) %v638_v57, 32 }
 0x294   :  { %v1084_v19 = vpop.f32.mrf.mxu2 }
 0x295   :  { %1102 = vxpose.xlu0.b32.end [16/16] (narrow) %v1084_v19, 32 }
 0x2ba   :  { %v657_v15 = vpop.trf.xlu1 }
 0x2bb   :  { %v689_v25 = vmax.f32 %v657_v15, -1e+30 }
 0x2bd   :  { %v693_v23 = vmax.f32 %v689_v25, -1e+30 }
 0x2bf   :  { %v697_v30 = vmax.f32 %v693_v23, -1e+30 }
 0x2c1   :  { %v2305_v20 = vpop.trf.xlu0 }
 0x2c2   :  { %v658_v8 = vpop.trf.xlu1  ;;  %v1135_v35 = vmax.f32 %v2305_v20, -1e+30 }
 0x2c3   :  { %v690_v0 = vmax.f32 %v658_v8, -1e+30 }
 0x2c4   :  { %v1139_v40 = vmax.f32 %v1135_v35, -1e+30 }
 0x2c5   :  { %v694_v24 = vmax.f32 %v690_v0, -1e+30 }
 0x2c6   :  { %v1143_v44 = vmax.f32 %v1139_v40, -1e+30 }
 0x2c7   :  { %v698_v33 = vmax.f32 %v694_v24, -1e+30 }
 0x2c9   :  { %v2307_v21 = vpop.trf.xlu0  ;;  %v701_v39 = vmax.f32 %v697_v30, %v698_v33 }
 0x2ca   :  { %v659_v12 = vpop.trf.xlu1  ;;  %v1136_v31 = vmax.f32 %v2307_v21, -1e+30 }
 0x2cb   :  { %v691_v26 = vmax.f32 %v659_v12, -1e+30 }
 0x2cc   :  { %v1140_v38 = vmax.f32 %v1136_v31, -1e+30 }
 0x2cd   :  { %v695_v1 = vmax.f32 %v691_v26, -1e+30 }
 0x2ce   :  { %v1144_v46 = vmax.f32 %v1140_v38, -1e+30 }
 0x2cf   :  { %v699_v34 = vmax.f32 %v695_v1, -1e+30 }
 0x2d0   :  { %v1147_v53 = vmax.f32 %v1143_v44, %v1144_v46 }
 0x2d1   :  { %v1105_v27 = vpop.trf.xlu0 }
 0x2d2   :  { %v660_v28 = vpop.trf.xlu1  ;;  %v1137_v36 = vmax.f32 %v1105_v27, -1e+30 }
 0x2d3   :  { %v692_v29 = vmax.f32 %v660_v28, -1e+30 }
 0x2d4   :  { %v1141_v41 = vmax.f32 %v1137_v36, -1e+30 }
 0x2d5   :  { %v696_v22 = vmax.f32 %v692_v29, -1e+30 }
 0x2d6   :  { %v1145_v48 = vmax.f32 %v1141_v41, -1e+30 }
 0x2d7   :  { %v700_v37 = vmax.f32 %v696_v22, -1e+30 }
 0x2d9   :  { %v702_v5 = vmax.f32 %v699_v34, %v700_v37  ;;  %v1106_v6 = vpop.trf.xlu0 }
 0x2da   :  { %v1138_v42 = vmax.f32 %v1106_v6, -1e+30 }
 0x2db   :  { %v703_v43 = vmax.f32 %v701_v39, %v702_v5 }
 0x2dc   :  { %v1142_v47 = vmax.f32 %v1138_v42, -1e+30 }
 0x2dd   :  { %v704_v49 = vrot.slane %v703_v43, 4 }
 0x2de   :  { %v1146_v50 = vmax.f32 %v1142_v47, -1e+30 }
 0x2df   :  { %v705_v51 = vmax.f32 %v703_v43, %v704_v49 }
 0x2e0   :  { %v1148_v54 = vmax.f32 %v1145_v48, %v1146_v50 }
 0x2e1   :  { %v706_v55 = vrot.slane %v705_v51, 2 }
 0x2e2   :  { %v1149_v45 = vmax.f32 %v1147_v53, %v1148_v54 }
 0x2e3   :  { %v707_v56 = vmax.f32 %v705_v51, %v706_v55 }
 0x2e4   :  { %v1150_v58 = vrot.slane %v1149_v45, 4 }
 0x2e5   :  { %v708_v59 = vrot.slane %v707_v56, 1 }
 0x2e6   :  { %v1151_v60 = vmax.f32 %v1149_v45, %v1150_v58 }
 0x2e7   :  { %v709_v63 = vmax.f32 %v707_v56, %v708_v59 }
 0x2e8   :  { %v1152_v11 = vrot.slane %v1151_v60, 2 }
 0x2e9   :  { %v710_v13 = vsub.f32 %v657_v15, %v709_v63  ;;  %v711_v14 = vsub.f32 %v658_v8, %v709_v63  ;;  %v712_v57 = vsub.f32 %v659_v12, %v709_v63  ;;  %v713_v17 = vsub.f32 %v660_v28, %v709_v63 }
 0x2ea   :  { %v1153_v19 = vmax.f32 %v1151_v60, %v1152_v11  ;;  %v714_v25 = vsub.f32 -1e+30, %v709_v63 }
 0x2eb   :  { %v726_v0 = vmul.f32 1.442695, %v710_v13  ;;  %v728_v26 = vmul.f32 1.442695, %v711_v14  ;;  %v730_v23 = vmul.f32 1.442695, %v712_v57 }
 0x2ec   :  { %v1154_v24 = vrot.slane %v1153_v19, 1  ;;  %v732_v1 = vmul.f32 1.442695, %v713_v17  ;;  %v734_v30 = vmul.f32 1.442695, %v714_v25 }
 0x2ed   :  { %1833 = vpow2.f32 %v726_v0 }
 0x2ee   :  { %1835 = vpow2.f32 %v728_v26  ;;  %v1155_v29 = vmax.f32 %v1153_v19, %v1154_v24 }
 0x2ef   :  { %1837 = vpow2.f32 %v730_v23 }
 0x2f0   :  { %v1156_v31 = vsub.f32 %v2305_v20, %v1155_v29  ;;  %v1157_v33 = vsub.f32 %v2307_v21, %v1155_v29  ;;  %v1158_v15 = vsub.f32 %v1105_v27, %v1155_v29  ;;  %v1159_v8 = vsub.f32 %v1106_v6, %v1155_v29 }
 0x2f1   :  { %1839 = vpow2.f32 %v732_v1  ;;  %v1160_v22 = vsub.f32 -1e+30, %v1155_v29 }
 0x2f2   :  { %v1172_v12 = vmul.f32 1.442695, %v1156_v31  ;;  %v1174_v28 = vmul.f32 1.442695, %v1157_v33  ;;  %1841 = vpow2.f32 %v734_v30  ;;  %v1176_v35 = vmul.f32 1.442695, %v1158_v15 }
 0x2f3   :  { %v2313_v34 = vpop.eup %1833  ;;  %v1178_v20 = vmul.f32 1.442695, %v1159_v8  ;;  %v1180_v27 = vmul.f32 1.442695, %v1160_v22  ;;  %v512_v22 = vld [vmem:[%s2392_s10] sm:$0x1] }
 0x2f4   :  { %v2315_v36 = vpop.eup %1835  ;;  %1843 = vpow2.f32 %v1172_v12 }
 0x2f5   :  { %v758_v37 = vadd.f32 %v2315_v36, %v2313_v34  ;;  %1845 = vpow2.f32 %v1174_v28  ;;  %v1838_v38 = vpop.eup %1837 }
 0x2f6   :  { %1847 = vpow2.f32 %v1176_v35 }
 0x2f7   :  { %v759_v21 = vadd.f32 %v1838_v38, %v758_v37  ;;  %v1840_v39 = vpop.eup %1839  ;;  %1849 = vpow2.f32 %v1178_v20  ;;  %v513_v20 = vsub.f32 1.0, %v512_v22  ;;  %v1760_v22 = vld [vmem:[#allocation12 + $0x28] sm:$0xff] }
 0x2f8   :  { %v1842_v5 = vpop.eup %1841  ;;  %1851 = vpow2.f32 %v1180_v27  ;;  %v1797_v27 = vld [vmem:[%s2392_s10] ss:$0 sm:$0xff] }
 0x2f9   :  { %v760_v6 = vadd.f32 %v1840_v39, %v759_v21 }
 0x2fa   :  { %v2319_v40 = vpop.eup %1843 }
 0x2fb   :  { %v2321_v41 = vpop.eup %1845  ;;  %v761_v42 = vadd.f32 %v1842_v5, %v760_v6 }
 0x2fc   :  { %v1204_v43 = vadd.f32 %v2321_v41, %v2319_v40  ;;  %v2325_v46 = vpop.eup %1847 }
 0x2fd   :  { %v762_v47 = vadd.f32 %v1842_v5, %v761_v42  ;;  %v2328_v44 = vpop.eup %1849  ;;  %v797_v42 = vperm.slane %v513_v20, 0  ;;  %v1524_v20 = vlaneseq }
 0x2fe   :  { %v1205_v49 = vadd.f32 %v2325_v46, %v1204_v43  ;;  %v2331_v51 = vpop.eup %1851 }
 0x2ff   :  { %v763_v48 = vadd.f32 %v1842_v5, %v762_v47 }
 0x300   :  { %v1206_v50 = vadd.f32 %v2328_v44, %v1205_v49 }
 0x301   :  { %v764_v53 = vadd.f32 %v1842_v5, %v763_v48 }
 0x302   :  { %v1207_v54 = vadd.f32 %v2331_v51, %v1206_v50  ;;  %v945_v50 = vmul.f32 %v1797_v27, %v2276_v2 }
 0x303   :  { %v765_v55 = vadd.f32 %v1842_v5, %v764_v53  ;;  %v943_v53 = vmul.f32 %v1797_v27, %v2279_v4 }
 0x304   :  { %v1208_v45 = vadd.f32 %v2331_v51, %v1207_v54 }
 0x305   :  { %v766_v56 = vadd.f32 %v1842_v5, %v765_v55 }
 0x306   :  { %v1209_v58 = vadd.f32 %v2331_v51, %v1208_v45 }
 0x307   :  { %v767_v59 = vadd.f32 %v1842_v5, %v766_v56 }
 0x308   :  { %v1210_v60 = vadd.f32 %v2331_v51, %v1209_v58 }
 0x309   :  { %v768_v63 = vadd.f32 %v1842_v5, %v767_v59  ;;  %v944_v59 = vmul.f32 %v1797_v27, %v2282_v7 }
 0x30a   :  { %v1211_v11 = vadd.f32 %v2331_v51, %v1210_v60 }
 0x30b   :  { %v769_v13 = vadd.f32 %v1842_v5, %v768_v63 }
 0x30c   :  { %v1212_v14 = vadd.f32 %v2331_v51, %v1211_v11  ;;  %v941_v11 = vmul.f32 %v1797_v27, %v2285_v9  ;;  %v1385_v9 = vmul.f32 %v1797_v27, %v2291_v16 }
 0x30d   :  { %v770_v57 = vadd.f32 %v1842_v5, %v769_v13 }
 0x30e   :  { %v1213_v17 = vadd.f32 %v2331_v51, %v1212_v14 }
 0x30f   :  { %v771_v19 = vadd.f32 %v1842_v5, %v770_v57 }
 0x310   :  { %v1214_v25 = vadd.f32 %v2331_v51, %v1213_v17 }
 0x311   :  { %v772_v0 = vadd.f32 %v1842_v5, %v771_v19 }
 0x312   :  { %v1215_v26 = vadd.f32 %v2331_v51, %v1214_v25 }
 0x313   :  { %v773_v23 = vrot.slane %v772_v0, 4 }
 0x314   :  { %v1216_v24 = vadd.f32 %v2331_v51, %v1215_v26 }
 0x315   :  { %v774_v1 = vadd.f32 %v773_v23, %v772_v0 }
 0x316   :  { %v1217_v29 = vadd.f32 %v2331_v51, %v1216_v24 }
 0x317   :  { %v775_v30 = vrot.slane %v774_v1, 2 }
 0x318   :  { %v1218_v31 = vadd.f32 %v2331_v51, %v1217_v29 }
 0x319   :  { %v776_v33 = vadd.f32 %v775_v30, %v774_v1  ;;  %v1384_v1 = vmul.f32 %v1797_v27, %v2297_v61  ;;  %v1796_v61 = vld [vmem:[%s2389_s7] ss:$0 sm:$0xff] }
 0x31a   :  { %v1219_v15 = vrot.slane %v1218_v31, 4 }
 0x31b   :  { %v777_v8 = vrot.slane %v776_v33, 1 }
 0x31c   :  { %v1220_v12 = vadd.f32 %v1219_v15, %v1218_v31 }
 0x31d   :  { %v778_v28 = vadd.f32 %v777_v8, %v776_v33 }
 0x31e   :  { %v1221_v35 = vrot.slane %v1220_v12, 2 }
 0x31f   :  { %1853 = vrcp.f32 %v778_v28  ;;  %v508_v28 = vadd.f32 %v1796_v61, %v2263_v32  ;;  %v1864_v32 = vld [vmem:[#allocation6 + $0x8] sm:$0xff] }
 0x320   :  { %v1222_v37 = vadd.f32 %v1221_v35, %v1220_v12  ;;  %v1761_v12 = vld [vmem:[#allocation12 + $0x30] sm:$0xff] }
 0x321   :  { %v511_v35 = vpack.c.bf16 %v508_v28, %v508_v28 }
 0x322   :  { %v1223_v21 = vrot.slane %v1222_v37, 1 }
 0x324   :  { %v1224_v6 = vadd.f32 %v1223_v21, %v1222_v37  ;;  %v1759_v37 = vld [vmem:[#allocation12 + $0x20] sm:$0xff]  ;;  %v1862_v21 = vld [vmem:[#allocation6] sm:$0xff] }
 0x325   :  { %v1854_v43 = vpop.eup %1853 }
 0x326   :  { %1855 = vrcp.f32 %v1224_v6  ;;  %v784_v47 = vmul.f32 %v1854_v43, %v1842_v5  ;;  %v782_v49 = vmul.f32 %v1854_v43, %v1838_v38  ;;  %v783_v48 = vmul.f32 %v1854_v43, %v1840_v39 }
 0x327   :  { %v780_v54 = vmul.f32 %v1854_v43, %v2313_v34  ;;  %v781_v55 = vmul.f32 %v1854_v43, %v2315_v36  ;;  %v942_v38 = vmul.f32 %v1797_v27, %v2288_v10  ;;  %v1383_v10 = vmul.f32 %v1797_v27, %v2294_v3 }
 0x328   :  { %v803_v45 = vmul.f32 %v797_v42, %v784_v47  ;;  %v801_v56 = vmul.f32 %v797_v42, %v782_v49  ;;  %v802_v58 = vmul.f32 %v797_v42, %v783_v48  ;;  %v1525_v6 = vand.u32 127, %v1524_v20  ;;  %v1863_v49 = vld [vmem:[#allocation3 + $0x8] sm:$0xff] }
 0x329   :  { %v799_v60 = vmul.f32 %v797_v42, %v780_v54  ;;  %v800_v63 = vmul.f32 %v797_v42, %v781_v55  ;;  %v1521_v48 = vsub.f32 %v1863_v49, %v1864_v32  ;;  %v1758_v54 = vld [vmem:[#allocation12 + $0x18] sm:$0xff] }
 0x32a   :  { %v961_v39 = vadd.f32 %v945_v50, %v803_v45  ;;  %v959_v5 = vadd.f32 %v943_v53, %v801_v56  ;;  %v960_v2 = vadd.f32 %v944_v59, %v802_v58  ;;  %vm1526_vm15 = vcmp.lt.s32.totalorder %v1525_v6, 32  ;;  %v1757_v45 = vld [vmem:[#allocation12 + $0x10] sm:$0xff]  ;;  %v1756_v56 = vld [vmem:[#allocation12 + $0x8] sm:$0xff]  ;;  %v1755_v58 = vld [vmem:[#allocation12] sm:$0xff] }
 0x32b   :  { %v957_v13 = vadd.f32 %v941_v11, %v799_v60  ;;  %v958_v4 = vadd.f32 %v942_v38, %v800_v63  ;;  %v1523_v50 = vadd.f32 1e-06, %v1521_v48 }
 0x32c   :  { %v1856_v14 = vpop.eup %1855  ;;  %v975_v34 = vpack.c.bf16 %v961_v39, %v961_v39  ;;  %v974_v57 = vpack.c.bf16 %v960_v2, %v959_v5 }
 0x32d   :  { %v1229_v36 = vmul.f32 %v1856_v14, %v2328_v44  ;;  %v1230_v17 = vmul.f32 %v1856_v14, %v2331_v51  ;;  %v973_v19 = vpack.c.bf16 %v958_v4, %v957_v13  ;;  %v1228_v7 = vmul.f32 %v1856_v14, %v2325_v46 }
 0x32e   :  { %981 = vmatpush.bf16.msrb.mxu0 %v975_v34  ;;  %v1226_v25 = vmul.f32 %v1856_v14, %v2319_v40  ;;  %v1227_v0 = vmul.f32 %v1856_v14, %v2321_v41  ;;  %v1381_v51 = vmul.f32 %v1797_v27, %v2300_v62  ;;  %v1382_v46 = vmul.f32 %v1797_v27, %v2303_v52  ;;  %v1762_v52 = vld [vmem:[#allocation12 + $0x38] sm:$0xff] }
 0x32f   :  { %v1246_v26 = vmul.f32 %v1230_v17, %v797_v42  ;;  %v1244_v23 = vmul.f32 %v1228_v7, %v797_v42  ;;  %v1245_v24 = vmul.f32 %v1229_v36, %v797_v42  ;;  %v506_v62 = vadd.f32 %v1796_v61, %v2251_v18  ;;  %v1861_v18 = vld [vmem:[#allocation3] sm:$0xff] }
 0x330   :  { %v1242_v44 = vmul.f32 %v1226_v25, %v797_v42  ;;  %v1243_v29 = vmul.f32 %v1227_v0, %v797_v42  ;;  %v1520_v27 = vsub.f32 %v1861_v18, %v1862_v21  ;;  %v1530_v53 = vsel %vm1526_vm15, %v1523_v50, 0.0  ;;  %v1798_v25 = vld [vmem:[%s2391_s9] ss:$0 sm:$0xff]  ;;  %s1571_s9 = sshll.u32 %s2393_s11, 4  ;;  %s1572_s9 = int_to_ptr.hbm [resolvable:$true] %s1571_s9 }
 0x331   :  { %v1401_v30 = vadd.f32 %v1385_v9, %v1246_v26  ;;  %v1399_v31 = vadd.f32 %v1383_v10, %v1244_v23  ;;  %v1400_v16 = vadd.f32 %v1384_v1, %v1245_v24  ;;  %v510_v8 = vpack.c.bf16 %v506_v62, %v506_v62 }
 0x332   :  { %982 = vmatpush.bf16.msrb.mxu0 %v975_v34  ;;  %v1397_v3 = vadd.f32 %v1381_v51, %v1242_v44  ;;  %v1398_v33 = vadd.f32 %v1382_v46, %v1243_v29  ;;  %v1522_v42 = vadd.f32 1e-06, %v1520_v27  ;;  %v1532_v55 = vmul.f32 %v1530_v53, %v1530_v53 }
 0x333   :  { %v1415_v40 = vpack.c.bf16 %v1401_v30, %v1401_v30  ;;  %v1414_v15 = vpack.c.bf16 %v1400_v16, %v1399_v31 }
 0x334   :  { %v1413_v41 = vpack.c.bf16 %v1398_v33, %v1397_v3  ;;  %v1529_v43 = vsel %vm1526_vm15, %v1522_v42, 0.0 }
 0x335   :  { %1421 = vmatpush.bf16.msra.mxu2 %v1415_v40  ;;  %v1531_v47 = vmul.f32 %v1529_v43, %v1529_v43 }
 0x336   :  { %983 = vmatpush.bf16.msrb.mxu0 %v975_v34 }
 0x337   :  { %1533 = vadd.xlane.f32.xlu2 %v1531_v47 }
 0x339   :  { %1422 = vmatpush.bf16.msra.mxu2 %v1415_v40 }
 0x33a   :  { %984 = vmatpush.bf16.msrb.mxu0 %v975_v34 }
 0x33d   :  { %1423 = vmatpush.bf16.msra.mxu2 %v1415_v40 }
 0x33e   :  { %985 = vmatpush.bf16.msrb.mxu0 %v975_v34 }
 0x33f   :  { %1535 = vadd.xlane.f32.xlu2 %v1532_v55 }
 0x341   :  { %1424 = vmatpush.bf16.msra.mxu2 %v1415_v40 }
 0x342   :  { %986 = vmatpush.bf16.msrb.mxu0 %v975_v34 }
 0x345   :  { %1425 = vmatpush.bf16.msra.mxu2 %v1415_v40 }
 0x346   :  { %987 = vmatpush.bf16.msrb.mxu0 %v974_v57 }
 0x349   :  { %1426 = vmatpush.bf16.msra.mxu2 %v1415_v40 }
 0x34a   :  { %988 = vmatpush.bf16.msrb.mxu0 %v973_v19 }
 0x34d   :  { %989 = vmatmul.bf16.vlgmr.msrb.gmra.mxu0 %v510_v8  ;;  %1427 = vmatpush.bf16.msra.mxu2 %v1414_v15 }
 0x34e   :  { %1506 = vmatpush.bf16.msra.mxu0 %v1762_v52 }
 0x351   :  { %1428 = vmatpush.bf16.msra.mxu2 %v1413_v41 }
 0x352   :  { %1507 = vmatpush.bf16.msra.mxu0 %v1761_v12 }
 0x354   :  { %1429 = vmatmul.bf16.vlgmr.msra.gmra.mxu2 %v511_v35 }
 0x356   :  { %1508 = vmatpush.bf16.msra.mxu0 %v1760_v22 }
 0x35a   :  { %1509 = vmatpush.bf16.msra.mxu0 %v1759_v37 }
 0x35e   :  { %1510 = vmatpush.bf16.msra.mxu0 %v1758_v54 }
 0x362   :  { %1511 = vmatpush.bf16.msra.mxu0 %v1757_v45 }
 0x366   :  { %1512 = vmatpush.bf16.msra.mxu0 %v1756_v56 }
 0x36a   :  { %1513 = vmatpush.bf16.msra.mxu0 %v1755_v58 }
 0x3aa   :  { %v1534_v39 = vpop.xlane.xlu2 %1533 }
 0x3ab   :  { %1857 = vrsqrt.f32 %v1534_v39  ;;  %vm1544_vm0 = vcmp.eq.f32.partialorder %v1534_v39, inf  ;;  %v1547_v0 = vand.u32 2147483648, %v1534_v39  ;;  %vm1546_vm1 = vcmp.eq.f32.partialorder %v1534_v39, 0.0 }
 0x3b1   :  { %v1858_v2 = vpop.eup %1857 }
 0x3b2   :  { %v1536_v5 = vpop.xlane.xlu2 %1535  ;;  %v1538_v13 = vmul.f32 %v1858_v2, %v1534_v39 }
 0x3b3   :  { %1859 = vrsqrt.f32 %v1536_v5  ;;  %vm1556_vm2 = vcmp.eq.f32.partialorder %v1536_v5, inf  ;;  %v1559_v46 = vand.u32 2147483648, %v1536_v5  ;;  %vm1558_vm3 = vcmp.eq.f32.partialorder %v1536_v5, 0.0 }
 0x3b4   :  { %v1539_v4 = vmul.f32 %v1858_v2, %v1538_v13 }
 0x3b6   :  { %v1540_v57 = vmul.f32 0.5, %v1539_v4 }
 0x3b8   :  { %v1541_v17 = vsub.f32 1.5, %v1540_v57 }
 0x3b9   :  { %v1860_v14 = vpop.eup %1859 }
 0x3ba   :  { %v1550_v34 = vmul.f32 %v1860_v14, %v1536_v5  ;;  %v1542_v7 = vmul.f32 %v1858_v2, %v1541_v17 }
 0x3bc   :  { %v1551_v36 = vmul.f32 %v1860_v14, %v1550_v34  ;;  %v1543_v9 = vmul.f32 %v1542_v7, %v1534_v39 }
 0x3be   :  { %v1552_v19 = vmul.f32 0.5, %v1551_v36  ;;  %v1545_v26 = vsel %vm1544_vm0, %v1534_v39, %v1543_v9 }
 0x3bf   :  { %v1548_v44 = vsel %vm1546_vm1, %v1547_v0, %v1545_v26 }
 0x3c0   :  { %v1553_v10 = vsub.f32 1.5, %v1552_v19 }
 0x3c2   :  { %v1554_v23 = vmul.f32 %v1860_v14, %v1553_v10 }
 0x3c4   :  { %v1555_v51 = vmul.f32 %v1554_v23, %v1536_v5 }
 0x3c6   :  { %v1557_v30 = vsel %vm1556_vm2, %v1536_v5, %v1555_v51 }
 0x3c7   :  { %v1560_v3 = vsel %vm1558_vm3, %v1559_v46, %v1557_v30 }
 0x3ca   :  { %v990_v59 = vpop.f32.mrf.mxu0 }
 0x3d2   :  { %v992_v60 = vpop.f32.mrf.mxu0 }
 0x3d7   :  { %v1430_v63 = vpop.f32.mrf.mxu2 }
 0x3d8   :  { %v1437_v11 = vpack.c.bf16 %v1430_v63, %v990_v59 }
 0x3da   :  { %1514 = vmatmul.bf16.vlgmr.msra.gmra.mxu0 %v1437_v11 }
 0x3df   :  { %v1432_v38 = vpop.f32.mrf.mxu2 }
 0x457   :  { %v1515_v24 = vpop.f32.mrf.mxu0 }
 0x458   :  { %v1516_v1 = vadd.f32 %v1798_v25, %v1515_v24 }
 0x45a   :  { %v1561_v29 = vmul.f32 %v1548_v44, %v1516_v1 }
 0x45c   :  { %1563 = vst [vmem:[#allocation14] sm:$0xff] %v1561_v29 }
 0x45f   :  { %v1517_v31 = vpop.f32.mrf.mxu0 }
 0x460   :  { %v1518_v16 = vadd.f32 %v1798_v25, %v1517_v31 }
 0x462   :  { %v1562_v33 = vmul.f32 %v1560_v3, %v1518_v16 }
 0x464   :  { %1564 = vst [vmem:[#allocation14 + $0x8] sm:$0xff] %v1562_v33 }
 0x465   :  { %1577 = dma.vmem_to_hbm [thread:$0]  %s1570_s17, 256, %s1572_s9, [#allocation5], %s2044_s22, %s2044_s22, %s2045_s23  }
 0x466   :  { %2041 = dma.done.wait [#allocation5], 256  }
 0x467   :  { %2042 = vsyncadd [#allocation5], 4294967040 }
 0x468   :  { %1582 = vsyncpa [#allocation4], 1 }
 0x469   :  { %1583 = vsyncpa [#allocation7], 1 }
 0x46a   :  { %1584 = vsyncpa [#allocation10], 1 }
 0x46b   :  { %1585 = vsyncpa [#allocation13], 1 }
 0x46c   :  { %1586 = vsyncpa [#allocation5], 1 }

</bundles_post_ra>
